<compile_context>
chip_gen: v5e
topology: v5e:2x2
jax: 0.10.0
libtpu: 0.0.40
codegen_flags: <defaults>
</compile_context>

<pallas_src>
import math
from functools import partial

import jax
import jax.numpy as jnp
from jax.experimental import pallas as pl
from jax.experimental.pallas import tpu as pltpu


def _round_up(x, m):
    return (x + m - 1) // m * m


def _tcb_kernel(*refs, K, dil, pad, has_downsample):
    if has_downsample:
        (x_ref, w1_ref, b1_ref, w2_ref, b2_ref,
         wd_ref, bd_ref, o_ref, h1p_ref) = refs
    else:
        (x_ref, w1_ref, b1_ref, w2_ref, b2_ref,
         o_ref, h1p_ref) = refs

    T, Mb, Cout = o_ref.shape
    Cin = x_ref.shape[-1]
    rows = T * Mb

    # ---- conv1 + bias + ReLU : K lane-dense (rows, Cin) @ (Cin, Cout) matmuls
    acc = jnp.dot(x_ref[pl.ds(0, T)].reshape(rows, Cin), w1_ref[0],
                  preferred_element_type=jnp.float32)
    for k in range(1, K):
        xk = x_ref[pl.ds(k * dil, T)].reshape(rows, Cin)
        acc = acc + jnp.dot(xk, w1_ref[k], preferred_element_type=jnp.float32)
    h1 = jnp.maximum(acc + b1_ref[...], 0.0)

    # ---- time-padded copy of h1 (VMEM scratch) for the second conv
    if pad > 0:
        edge = jnp.zeros((pad, Mb, Cout), jnp.float32)
        h1p_ref[pl.ds(0, pad)] = edge
        h1p_ref[pl.ds(pad + T, pad)] = edge
    h1p_ref[pl.ds(pad, T)] = h1.reshape(T, Mb, Cout)

    # ---- conv2 + bias + ReLU
    acc2 = jnp.dot(h1p_ref[pl.ds(0, T)].reshape(rows, Cout), w2_ref[0],
                   preferred_element_type=jnp.float32)
    for k in range(1, K):
        hk = h1p_ref[pl.ds(k * dil, T)].reshape(rows, Cout)
        acc2 = acc2 + jnp.dot(hk, w2_ref[k], preferred_element_type=jnp.float32)
    h2 = jnp.maximum(acc2 + b2_ref[...], 0.0)

    # ---- residual: 1x1 downsample conv, or identity when C_in == C_out
    xc = x_ref[pl.ds(pad, T)].reshape(rows, Cin)
    if has_downsample:
        res = jnp.dot(xc, wd_ref[...],
                      preferred_element_type=jnp.float32) + bd_ref[...]
    else:
        res = xc  # Cin == Cout (identically padded)

    o_ref[...] = jnp.maximum(h2 + res, 0.0).reshape(T, Mb, Cout).astype(o_ref.dtype)


@partial(jax.jit, static_argnames=("kernel_size", "dilation", "block_m"))
def temporal_conv_block(x, w1, b1, w2, b2, wd=None, bd=None, *,
                        kernel_size=3, dilation=1, block_m=8):
    B, T, N, C_in = x.shape
    C_out = w1.shape[0]
    K, dil = kernel_size, dilation
    pad = dil * (K - 1) // 2
    if T + 2 * pad - dil * (K - 1) != T:
        raise ValueError("kernel assumes 'same' temporal length (odd kernel_size)")
    if block_m % 8 != 0:
        raise ValueError("block_m must be a multiple of 8 (sublane width)")
    has_downsample = wd is not None

    LANE = 128
    Cin_p, Cout_p = _round_up(C_in, LANE), _round_up(C_out, LANE)
    M = B * N
    M_p = _round_up(M, block_m)
    T_pad = T + 2 * pad

    # TODO(synk): the PyTorch forward's data-dependent NaN counting / logging
    # and gradient checkpointing are training-time diagnostics with no kernel
    # equivalent; only the unconditional nan_to_num of the input is kept.
    x = jnp.nan_to_num(x.astype(jnp.float32))

    # exact .permute(0,3,1,2).contiguous().view(B*N, C_in, T) semantics
    x_temp = jnp.transpose(x, (0, 3, 1, 2)).reshape(M, C_in, T)

    # time-major / channels-last / lane-padded kernel layout
    xk = jnp.transpose(x_temp, (2, 0, 1))                              # [T, M, C_in]
    xk = jnp.pad(xk, ((pad, pad), (0, M_p - M), (0, Cin_p - C_in)))    # [T_pad, M_p, Cin_p]

    def prep_w(w, cin_p):     # [C_out, C_in_w, Kw] -> [Kw, cin_p, Cout_p]
        wt = jnp.transpose(w.astype(jnp.float32), (2, 1, 0))
        return jnp.pad(wt, ((0, 0), (0, cin_p - wt.shape[1]),
                            (0, Cout_p - wt.shape[2])))

    def prep_b(b):
        return jnp.pad(b.astype(jnp.float32),
                       (0, Cout_p - b.shape[0])).reshape(1, Cout_p)

    w1k, b1k = prep_w(w1, Cin_p), prep_b(b1)
    w2k, b2k = prep_w(w2, Cout_p), prep_b(b2)

    inputs = [xk, w1k, b1k, w2k, b2k]
    in_specs = [
        pl.BlockSpec((T_pad, block_m, Cin_p), lambda j: (0, j, 0)),
        pl.BlockSpec((K, Cin_p, Cout_p), lambda j: (0, 0, 0)),
        pl.BlockSpec((1, Cout_p), lambda j: (0, 0)),
        pl.BlockSpec((K, Cout_p, Cout_p), lambda j: (0, 0, 0)),
        pl.BlockSpec((1, Cout_p), lambda j: (0, 0)),
    ]
    flops = 2 * M * T * K * C_in * C_out + 2 * M * T * K * C_out * C_out
    bytes_accessed = 4 * (xk.size + w1k.size + b1k.size + w2k.size + b2k.size
                          + T * M_p * Cout_p)
    if has_downsample:
        wdk = prep_w(wd, Cin_p)[0]            # 1x1 conv -> (Cin_p, Cout_p)
        bdk = prep_b(bd)
        inputs += [wdk, bdk]
        in_specs += [pl.BlockSpec((Cin_p, Cout_p), lambda j: (0, 0)),
                     pl.BlockSpec((1, Cout_p), lambda j: (0, 0))]
        flops += 2 * M * T * C_in * C_out
        bytes_accessed += 4 * (wdk.size + bdk.size)

    out = pl.pallas_call(
        partial(_tcb_kernel, K=K, dil=dil, pad=pad,
                has_downsample=has_downsample),
        out_shape=jax.ShapeDtypeStruct((T, M_p, Cout_p), jnp.float32),
        grid_spec=pltpu.PrefetchScalarGridSpec(
            num_scalar_prefetch=0,
            grid=(M_p // block_m,),
            in_specs=in_specs,
            out_specs=pl.BlockSpec((T, block_m, Cout_p), lambda j: (0, j, 0)),
            scratch_shapes=[pltpu.VMEM((T_pad, block_m, Cout_p), jnp.float32)],
        ),
        compiler_params=pltpu.CompilerParams(
            dimension_semantics=("parallel",)),
        cost_estimate=pl.CostEstimate(flops=flops, transcendentals=0,
                                      bytes_accessed=bytes_accessed),
    )(*inputs)

    # back to the PyTorch output layout: out.view(B,N,C_out,T).permute(0,3,1,2)
    out = out[:, :M, :C_out]                          # drop lane / sample padding
    out = jnp.transpose(out, (1, 2, 0)).reshape(B, N, C_out, T)
    return jnp.transpose(out, (0, 3, 1, 2))           # [B, T, N, C_out]


def _reference(x, w1, b1, w2, b2, wd, bd, kernel_size, dilation):
    """Pure-JAX replica of the PyTorch forward."""
    B, T, N, C_in = x.shape
    C_out = w1.shape[0]
    pad = dilation * (kernel_size - 1) // 2
    x = jnp.nan_to_num(x.astype(jnp.float32))
    xt = jnp.transpose(x, (0, 3, 1, 2)).reshape(B * N, C_in, T)

    def conv1d(v, w, b, d, p):
        o = jax.lax.conv_general_dilated(
            v, w.astype(jnp.float32), window_strides=(1,), padding=[(p, p)],
            rhs_dilation=(d,), dimension_numbers=("NCH", "OIH", "NCH"),
            precision=jax.lax.Precision.HIGHEST)
        return o + b[None, :, None]

    h = jax.nn.relu(conv1d(xt, w1, b1, dilation, pad))
    h = jax.nn.relu(conv1d(h, w2, b2, dilation, pad))
    res = conv1d(xt, wd, bd, 1, 0) if wd is not None else xt
    o = jax.nn.relu(h + res)
    return jnp.transpose(o.reshape(B, N, C_out, T), (0, 3, 1, 2))


if __name__ == "__main__":
    B, T, N = 2, 16, 8
    K, dil = 3, 1
    key = jax.random.PRNGKey(0)

    def make_case(k, c_in, c_out):
        ks = jax.random.split(k, 8)
        x = jax.random.normal(ks[0], (B, T, N, c_in), jnp.float32)
        w1 = 0.01 * jax.random.normal(ks[1], (c_out, c_in, K), jnp.float32)
        b1 = 0.05 * jax.random.normal(ks[2], (c_out,), jnp.float32)
        w2 = 0.01 * jax.random.normal(ks[3], (c_out, c_out, K), jnp.float32)
        b2 = 0.05 * jax.random.normal(ks[4], (c_out,), jnp.float32)
        if c_in != c_out:
            wd = 0.01 * jax.random.normal(ks[5], (c_out, c_in, 1), jnp.float32)
            bd = 0.05 * jax.random.normal(ks[6], (c_out,), jnp.float32)
        else:
            wd, bd = None, None
        return x, w1, b1, w2, b2, wd, bd

    k1, k2 = jax.random.split(key)

    # case 1: C_in != C_out -> 1x1 downsample residual path
    args1 = make_case(k1, 4, 32)
    out1 = jax.block_until_ready(
        temporal_conv_block(*args1, kernel_size=K, dilation=dil, block_m=8))
    ref1 = _reference(*args1, K, dil)
    assert out1.shape == (B, T, N, 32)
    assert jnp.allclose(out1, ref1, atol=1e-4, rtol=1e-4), \
        float(jnp.max(jnp.abs(out1 - ref1)))

    # case 2: C_in == C_out -> identity residual path
    args2 = make_case(k2, 32, 32)
    out2 = jax.block_until_ready(
        temporal_conv_block(*args2, kernel_size=K, dilation=dil, block_m=8))
    ref2 = _reference(*args2, K, dil)
    assert out2.shape == (B, T, N, 32)
    assert jnp.allclose(out2, ref2, atol=1e-4, rtol=1e-4), \
        float(jnp.max(jnp.abs(out2 - ref2)))

    print("KERNEL_OK")
</pallas_src>

<mosaic_0001>
module attributes {stable_mosaic.version = 11 : i64} {
  func.func @_tcb_kernel(%arg0: i32, %arg1: memref<18x8x128xf32, #tpu.memory_space<vmem>>, %arg2: memref<3x128x128xf32, #tpu.memory_space<vmem>>, %arg3: memref<1x128xf32, #tpu.memory_space<vmem>>, %arg4: memref<3x128x128xf32, #tpu.memory_space<vmem>>, %arg5: memref<1x128xf32, #tpu.memory_space<vmem>>, %arg6: memref<128x128xf32, #tpu.memory_space<vmem>>, %arg7: memref<1x128xf32, #tpu.memory_space<vmem>>, %arg8: memref<16x8x128xf32, #tpu.memory_space<vmem>>, %arg9: memref<18x8x128xf32, #tpu.memory_space<vmem>>) attributes {dimension_semantics = [#tpu.dimension_semantics<parallel>], iteration_bounds = array<i64: 2>, scalar_prefetch = 0 : i64, scratch_operands = 1 : i64, tpu.core_type = #tpu.core_type<tc>, window_params = [{transform_indices = @transform_0, window_bounds = array<i64: 18, 8, 128>}, {pipeline_mode = #tpu.pipeline_mode<synchronous>, transform_indices = @transform_1, window_bounds = array<i64: 3, 128, 128>}, {pipeline_mode = #tpu.pipeline_mode<synchronous>, transform_indices = @transform_2, window_bounds = array<i64: 1, 128>}, {pipeline_mode = #tpu.pipeline_mode<synchronous>, transform_indices = @transform_3, window_bounds = array<i64: 3, 128, 128>}, {pipeline_mode = #tpu.pipeline_mode<synchronous>, transform_indices = @transform_4, window_bounds = array<i64: 1, 128>}, {pipeline_mode = #tpu.pipeline_mode<synchronous>, transform_indices = @transform_5, window_bounds = array<i64: 128, 128>}, {pipeline_mode = #tpu.pipeline_mode<synchronous>, transform_indices = @transform_6, window_bounds = array<i64: 1, 128>}, {transform_indices = @transform_7, window_bounds = array<i64: 16, 8, 128>}]} {
    %c0 = arith.constant 0 : index
    %c0_0 = arith.constant 0 : index
    %c0_1 = arith.constant 0 : index
    %0 = vector.load %arg1[%c0, %c0_0, %c0_1] : memref<18x8x128xf32, #tpu.memory_space<vmem>>, vector<16x8x128xf32>
    %1 = vector.shape_cast %0 : vector<16x8x128xf32> to vector<128x128xf32>
    %c0_2 = arith.constant 0 : index
    %c0_3 = arith.constant 0 : index
    %c0_4 = arith.constant 0 : index
    %2 = vector.load %arg2[%c0_2, %c0_3, %c0_4] : memref<3x128x128xf32, #tpu.memory_space<vmem>>, vector<1x128x128xf32>
    %3 = vector.shape_cast %2 : vector<1x128x128xf32> to vector<128x128xf32>
    %cst = arith.constant dense<0.000000e+00> : vector<128x128xf32>
    %4 = tpu.matmul %1, %3, %cst {dimension_numbers = #tpu.dot_dimension_numbers<[1], [0], [0], [1], [0, 0, 1, 1], [], []>} : vector<128x128xf32>, vector<128x128xf32>, vector<128x128xf32> -> vector<128x128xf32>
    %c1 = arith.constant 1 : index
    %c0_5 = arith.constant 0 : index
    %c0_6 = arith.constant 0 : index
    %5 = vector.load %arg1[%c1, %c0_5, %c0_6] : memref<18x8x128xf32, #tpu.memory_space<vmem>>, vector<16x8x128xf32>
    %6 = vector.shape_cast %5 : vector<16x8x128xf32> to vector<128x128xf32>
    %c1_7 = arith.constant 1 : index
    %c0_8 = arith.constant 0 : index
    %c0_9 = arith.constant 0 : index
    %7 = vector.load %arg2[%c1_7, %c0_8, %c0_9] : memref<3x128x128xf32, #tpu.memory_space<vmem>>, vector<1x128x128xf32>
    %8 = vector.shape_cast %7 : vector<1x128x128xf32> to vector<128x128xf32>
    %cst_10 = arith.constant dense<0.000000e+00> : vector<128x128xf32>
    %9 = tpu.matmul %6, %8, %cst_10 {dimension_numbers = #tpu.dot_dimension_numbers<[1], [0], [0], [1], [0, 0, 1, 1], [], []>} : vector<128x128xf32>, vector<128x128xf32>, vector<128x128xf32> -> vector<128x128xf32>
    %10 = arith.addf %4, %9 : vector<128x128xf32>
    %c2 = arith.constant 2 : index
    %c0_11 = arith.constant 0 : index
    %c0_12 = arith.constant 0 : index
    %11 = vector.load %arg1[%c2, %c0_11, %c0_12] : memref<18x8x128xf32, #tpu.memory_space<vmem>>, vector<16x8x128xf32>
    %12 = vector.shape_cast %11 : vector<16x8x128xf32> to vector<128x128xf32>
    %c2_13 = arith.constant 2 : index
    %c0_14 = arith.constant 0 : index
    %c0_15 = arith.constant 0 : index
    %13 = vector.load %arg2[%c2_13, %c0_14, %c0_15] : memref<3x128x128xf32, #tpu.memory_space<vmem>>, vector<1x128x128xf32>
    %14 = vector.shape_cast %13 : vector<1x128x128xf32> to vector<128x128xf32>
    %cst_16 = arith.constant dense<0.000000e+00> : vector<128x128xf32>
    %15 = tpu.matmul %12, %14, %cst_16 {dimension_numbers = #tpu.dot_dimension_numbers<[1], [0], [0], [1], [0, 0, 1, 1], [], []>} : vector<128x128xf32>, vector<128x128xf32>, vector<128x128xf32> -> vector<128x128xf32>
    %16 = arith.addf %10, %15 : vector<128x128xf32>
    %c0_17 = arith.constant 0 : index
    %c0_18 = arith.constant 0 : index
    %17 = vector.load %arg3[%c0_17, %c0_18] : memref<1x128xf32, #tpu.memory_space<vmem>>, vector<1x128xf32>
    %18 = vector.broadcast %17 : vector<1x128xf32> to vector<128x128xf32>
    %19 = arith.addf %16, %18 : vector<128x128xf32>
    %cst_19 = arith.constant 0.000000e+00 : f32
    %20 = vector.broadcast %cst_19 : f32 to vector<128x128xf32>
    %21 = arith.maximumf %19, %20 : vector<128x128xf32>
    %cst_20 = arith.constant 0.000000e+00 : f32
    %22 = vector.broadcast %cst_20 : f32 to vector<1x8x128xf32>
    %c0_21 = arith.constant 0 : index
    %c0_22 = arith.constant 0 : index
    %c0_23 = arith.constant 0 : index
    %23 = vector.load %arg9[%c0_21, %c0_22, %c0_23] : memref<18x8x128xf32, #tpu.memory_space<vmem>>, vector<1x8x128xf32>
    tpu.vector_store %arg9[%c0_21, %c0_22, %c0_23], %22 {strides = array<i32>} : memref<18x8x128xf32, #tpu.memory_space<vmem>>, vector<1x8x128xf32>,
    %c17 = arith.constant 17 : index
    %c0_24 = arith.constant 0 : index
    %c0_25 = arith.constant 0 : index
    %24 = vector.load %arg9[%c17, %c0_24, %c0_25] : memref<18x8x128xf32, #tpu.memory_space<vmem>>, vector<1x8x128xf32>
    tpu.vector_store %arg9[%c17, %c0_24, %c0_25], %22 {strides = array<i32>} : memref<18x8x128xf32, #tpu.memory_space<vmem>>, vector<1x8x128xf32>,
    %25 = vector.shape_cast %21 : vector<128x128xf32> to vector<16x8x128xf32>
    %c1_26 = arith.constant 1 : index
    %c0_27 = arith.constant 0 : index
    %c0_28 = arith.constant 0 : index
    %26 = vector.load %arg9[%c1_26, %c0_27, %c0_28] : memref<18x8x128xf32, #tpu.memory_space<vmem>>, vector<16x8x128xf32>
    tpu.vector_store %arg9[%c1_26, %c0_27, %c0_28], %25 {strides = array<i32>} : memref<18x8x128xf32, #tpu.memory_space<vmem>>, vector<16x8x128xf32>,
    %c0_29 = arith.constant 0 : index
    %c0_30 = arith.constant 0 : index
    %c0_31 = arith.constant 0 : index
    %27 = vector.load %arg9[%c0_29, %c0_30, %c0_31] : memref<18x8x128xf32, #tpu.memory_space<vmem>>, vector<16x8x128xf32>
    %28 = vector.shape_cast %27 : vector<16x8x128xf32> to vector<128x128xf32>
    %c0_32 = arith.constant 0 : index
    %c0_33 = arith.constant 0 : index
    %c0_34 = arith.constant 0 : index
    %29 = vector.load %arg4[%c0_32, %c0_33, %c0_34] : memref<3x128x128xf32, #tpu.memory_space<vmem>>, vector<1x128x128xf32>
    %30 = vector.shape_cast %29 : vector<1x128x128xf32> to vector<128x128xf32>
    %cst_35 = arith.constant dense<0.000000e+00> : vector<128x128xf32>
    %31 = tpu.matmul %28, %30, %cst_35 {dimension_numbers = #tpu.dot_dimension_numbers<[1], [0], [0], [1], [0, 0, 1, 1], [], []>} : vector<128x128xf32>, vector<128x128xf32>, vector<128x128xf32> -> vector<128x128xf32>
    %c1_36 = arith.constant 1 : index
    %c0_37 = arith.constant 0 : index
    %c0_38 = arith.constant 0 : index
    %32 = vector.load %arg9[%c1_36, %c0_37, %c0_38] : memref<18x8x128xf32, #tpu.memory_space<vmem>>, vector<16x8x128xf32>
    %33 = vector.shape_cast %32 : vector<16x8x128xf32> to vector<128x128xf32>
    %c1_39 = arith.constant 1 : index
    %c0_40 = arith.constant 0 : index
    %c0_41 = arith.constant 0 : index
    %34 = vector.load %arg4[%c1_39, %c0_40, %c0_41] : memref<3x128x128xf32, #tpu.memory_space<vmem>>, vector<1x128x128xf32>
    %35 = vector.shape_cast %34 : vector<1x128x128xf32> to vector<128x128xf32>
    %cst_42 = arith.constant dense<0.000000e+00> : vector<128x128xf32>
    %36 = tpu.matmul %33, %35, %cst_42 {dimension_numbers = #tpu.dot_dimension_numbers<[1], [0], [0], [1], [0, 0, 1, 1], [], []>} : vector<128x128xf32>, vector<128x128xf32>, vector<128x128xf32> -> vector<128x128xf32>
    %37 = arith.addf %31, %36 : vector<128x128xf32>
    %c2_43 = arith.constant 2 : index
    %c0_44 = arith.constant 0 : index
    %c0_45 = arith.constant 0 : index
    %38 = vector.load %arg9[%c2_43, %c0_44, %c0_45] : memref<18x8x128xf32, #tpu.memory_space<vmem>>, vector<16x8x128xf32>
    %39 = vector.shape_cast %38 : vector<16x8x128xf32> to vector<128x128xf32>
    %c2_46 = arith.constant 2 : index
    %c0_47 = arith.constant 0 : index
    %c0_48 = arith.constant 0 : index
    %40 = vector.load %arg4[%c2_46, %c0_47, %c0_48] : memref<3x128x128xf32, #tpu.memory_space<vmem>>, vector<1x128x128xf32>
    %41 = vector.shape_cast %40 : vector<1x128x128xf32> to vector<128x128xf32>
    %cst_49 = arith.constant dense<0.000000e+00> : vector<128x128xf32>
    %42 = tpu.matmul %39, %41, %cst_49 {dimension_numbers = #tpu.dot_dimension_numbers<[1], [0], [0], [1], [0, 0, 1, 1], [], []>} : vector<128x128xf32>, vector<128x128xf32>, vector<128x128xf32> -> vector<128x128xf32>
    %43 = arith.addf %37, %42 : vector<128x128xf32>
    %c0_50 = arith.constant 0 : index
    %c0_51 = arith.constant 0 : index
    %44 = vector.load %arg5[%c0_50, %c0_51] : memref<1x128xf32, #tpu.memory_space<vmem>>, vector<1x128xf32>
    %45 = vector.broadcast %44 : vector<1x128xf32> to vector<128x128xf32>
    %46 = arith.addf %43, %45 : vector<128x128xf32>
    %cst_52 = arith.constant 0.000000e+00 : f32
    %47 = vector.broadcast %cst_52 : f32 to vector<128x128xf32>
    %48 = arith.maximumf %46, %47 : vector<128x128xf32>
    %c1_53 = arith.constant 1 : index
    %c0_54 = arith.constant 0 : index
    %c0_55 = arith.constant 0 : index
    %49 = vector.load %arg1[%c1_53, %c0_54, %c0_55] : memref<18x8x128xf32, #tpu.memory_space<vmem>>, vector<16x8x128xf32>
    %50 = vector.shape_cast %49 : vector<16x8x128xf32> to vector<128x128xf32>
    %c0_56 = arith.constant 0 : index
    %c0_57 = arith.constant 0 : index
    %51 = vector.load %arg6[%c0_56, %c0_57] : memref<128x128xf32, #tpu.memory_space<vmem>>, vector<128x128xf32>
    %cst_58 = arith.constant dense<0.000000e+00> : vector<128x128xf32>
    %52 = tpu.matmul %50, %51, %cst_58 {dimension_numbers = #tpu.dot_dimension_numbers<[1], [0], [0], [1], [0, 0, 1, 1], [], []>} : vector<128x128xf32>, vector<128x128xf32>, vector<128x128xf32> -> vector<128x128xf32>
    %c0_59 = arith.constant 0 : index
    %c0_60 = arith.constant 0 : index
    %53 = vector.load %arg7[%c0_59, %c0_60] : memref<1x128xf32, #tpu.memory_space<vmem>>, vector<1x128xf32>
    %54 = vector.broadcast %53 : vector<1x128xf32> to vector<128x128xf32>
    %55 = arith.addf %52, %54 : vector<128x128xf32>
    %56 = arith.addf %48, %55 : vector<128x128xf32>
    %cst_61 = arith.constant 0.000000e+00 : f32
    %57 = vector.broadcast %cst_61 : f32 to vector<128x128xf32>
    %58 = arith.maximumf %56, %57 : vector<128x128xf32>
    %59 = vector.shape_cast %58 : vector<128x128xf32> to vector<16x8x128xf32>
    %c0_62 = arith.constant 0 : index
    %c0_63 = arith.constant 0 : index
    %c0_64 = arith.constant 0 : index
    %60 = vector.load %arg8[%c0_62, %c0_63, %c0_64] : memref<16x8x128xf32, #tpu.memory_space<vmem>>, vector<16x8x128xf32>
    tpu.vector_store %arg8[%c0_62, %c0_63, %c0_64], %59 {strides = array<i32>} : memref<16x8x128xf32, #tpu.memory_space<vmem>>, vector<16x8x128xf32>,
    return
  }
  func.func @transform_0(%arg0: i32) -> (i32, i32, i32) {
    %c0_i32 = arith.constant 0 : i32
    %c0_i32_0 = arith.constant 0 : i32
    %c0_i32_1 = arith.constant 0 : i32
    return %c0_i32, %arg0, %c0_i32_0 : i32, i32, i32
  }
  func.func @transform_1(%arg0: i32) -> (i32, i32, i32) {
    %c0_i32 = arith.constant 0 : i32
    %c0_i32_0 = arith.constant 0 : i32
    %c0_i32_1 = arith.constant 0 : i32
    %c0_i32_2 = arith.constant 0 : i32
    return %c0_i32, %c0_i32_0, %c0_i32_1 : i32, i32, i32
  }
  func.func @transform_2(%arg0: i32) -> (i32, i32) {
    %c0_i32 = arith.constant 0 : i32
    %c0_i32_0 = arith.constant 0 : i32
    %c0_i32_1 = arith.constant 0 : i32
    return %c0_i32, %c0_i32_0 : i32, i32
  }
  func.func @transform_3(%arg0: i32) -> (i32, i32, i32) {
    %c0_i32 = arith.constant 0 : i32
    %c0_i32_0 = arith.constant 0 : i32
    %c0_i32_1 = arith.constant 0 : i32
    %c0_i32_2 = arith.constant 0 : i32
    return %c0_i32, %c0_i32_0, %c0_i32_1 : i32, i32, i32
  }
  func.func @transform_4(%arg0: i32) -> (i32, i32) {
    %c0_i32 = arith.constant 0 : i32
    %c0_i32_0 = arith.constant 0 : i32
    %c0_i32_1 = arith.constant 0 : i32
    return %c0_i32, %c0_i32_0 : i32, i32
  }
  func.func @transform_5(%arg0: i32) -> (i32, i32) {
    %c0_i32 = arith.constant 0 : i32
    %c0_i32_0 = arith.constant 0 : i32
    %c0_i32_1 = arith.constant 0 : i32
    return %c0_i32, %c0_i32_0 : i32, i32
  }
  func.func @transform_6(%arg0: i32) -> (i32, i32) {
    %c0_i32 = arith.constant 0 : i32
    %c0_i32_0 = arith.constant 0 : i32
    %c0_i32_1 = arith.constant 0 : i32
    return %c0_i32, %c0_i32_0 : i32, i32
  }
  func.func @transform_7(%arg0: i32) -> (i32, i32, i32) {
    %c0_i32 = arith.constant 0 : i32
    %c0_i32_0 = arith.constant 0 : i32
    %c0_i32_1 = arith.constant 0 : i32
    return %c0_i32, %arg0, %c0_i32_0 : i32, i32, i32
  }
}

</mosaic_0001>

<bundles_post_ra>
// kernel: temporal_conv_block.1
= control target key start
LH: loop header
LB: loop body
LE: loop exit
PB: predicated region body
PF: predicated region fallthrough
CT: control target
= control target key end

     0   :  { %s1662_s24 = smov 0   ;;  %s1664_s25 = smov 0   ;;  %s2363_s0 = inlined_call_operand.vmem [shape: f32[18,16,128], index: 0, kind: input, shape index: {}]   ;;  %s2364_s1 = inlined_call_operand.vmem [shape: f32[3,128,128], index: 1, kind: input, shape index: {}]   ;;  %s2365_s2 = inlined_call_operand.vmem [shape: f32[1,128], index: 2, kind: input, shape index: {}]   ;;  %s2366_s3 = inlined_call_operand.vmem [shape: f32[3,128,128], index: 3, kind: input, shape index: {}]   ;;  %s2367_s4 = inlined_call_operand.vmem [shape: f32[1,128], index: 4, kind: input, shape index: {}]   ;;  %s2368_s5 = inlined_call_operand.vmem [shape: f32[128,128], index: 5, kind: input, shape index: {}]   ;;  %s2369_s6 = inlined_call_operand.vmem [shape: f32[1,128], index: 6, kind: input, shape index: {}]   ;;  %s2370_s7 = inlined_call_operand.vmem [shape: f32[16,16,128], index: 7, kind: output, shape index: {}]  }
   0x1   :  { %s1666_s26 = smov 0  }
   0x2 LB: > { %s1396_s27 = sadd.s32 4294967295, %s1619_s26   ;;  %s1679_s28 = sadd.s32 1, %s1619_s26   ;;  %s1619_s26 = sphi %s1666_s26, %s2374_s26   ;;  %s1615_s25 = sphi %s1664_s25, %s2373_s25   ;;  %s1611_s24 = sphi %s1662_s24, %s2372_s24  }
   0x3   : > { %s21_s29 = ssub.s32 %s1619_s26, %s1679_s28  ;;  %s24_s30 = sadd.s32 1, %s1615_s25 }
   0x4   : > { %p22_p0 = scmp.eq.s32.totalorder %s21_s29, 0  ;;  %p31_p1 = scmp.ne.s32.totalorder %s1615_s25, %s1611_s24 }
   0x5   : > { %p32_p2 = scmp.eq.s32.totalorder %s1619_s26, 0  ;;  %p187_p3 = scmp.eq.s32.totalorder %s1396_s27, 1 }
   0x6   : > { %s1690_s8 = scalar_select %p22_p0, %s1615_s25, %s24_s30  }
   0x7   : > { %p33_p4 = por %p32_p2, %p31_p1  ;;  %p1692_p5 = por %p187_p3, %p31_p1 }
   0x8   : > { %p1399_p6 = scmp.ge.s32.totalorder %s1619_s26, 2 }
   0xa   : > { %227 = sbr.rel (%p1399_p6) target bundleno = 37 (0x25), region = 40 }
   0xf   : > { %230 = sbr.rel (!%p33_p4) target bundleno = 37 (0x25), region = 44  ;;  %s232_s10 = sand.u32 (%p33_p4), 1, %s1615_s25  }
  0x10   : > { %s1400_s11 = sshll.u32 (%p33_p4), %s1619_s26, 3  ;;  %s1567_s12 = smul.u32 (%p33_p4), 144, %s232_s10 }
  0x11   : > { %s1702_s15 = scalar_lea.vmem (%p33_p4), %s2363_s0, %s1400_s11 }
  0x12   : > { %v299_v0 = vld [vmem:[%s1702_s15] sm:$0xff] (%p33_p4)  ;;  %v301_v1 = vld [vmem:[%s1702_s15 + $0x10] sm:$0xff] (%p33_p4)  ;;  %s1707_s16 = scalar_lea.vmem (%p33_p4), [#allocation3], %s1567_s12 }
  0x13   : > { %v303_v2 = vld [vmem:[%s1702_s15 + $0x20] sm:$0xff] (%p33_p4)  ;;  %300 = vst [vmem:[%s1707_s16] sm:$0xff] (%p33_p4), %v299_v0  ;;  %v305_v3 = vld [vmem:[%s1702_s15 + $0x30] sm:$0xff] (%p33_p4) }
  0x14   : > { %302 = vst [vmem:[%s1707_s16 + $0x8] sm:$0xff] %v301_v1  ;;  %v307_v4 = vld [vmem:[%s1702_s15 + $0x40] sm:$0xff]  ;;  %v309_v5 = vld [vmem:[%s1702_s15 + $0x50] sm:$0xff] }
  0x15   : > { %304 = vst [vmem:[%s1707_s16 + $0x10] sm:$0xff] %v303_v2  ;;  %v311_v6 = vld [vmem:[%s1702_s15 + $0x60] sm:$0xff]  ;;  %v313_v7 = vld [vmem:[%s1702_s15 + $0x70] sm:$0xff] }
  0x16   : > { %306 = vst [vmem:[%s1707_s16 + $0x18] sm:$0xff] %v305_v3  ;;  %v315_v8 = vld [vmem:[%s1702_s15 + $0x80] sm:$0xff]  ;;  %v317_v9 = vld [vmem:[%s1702_s15 + $0x90] sm:$0xff] }
  0x17   : > { %308 = vst [vmem:[%s1707_s16 + $0x20] sm:$0xff] %v307_v4  ;;  %v319_v10 = vld [vmem:[%s1702_s15 + $0xa0] sm:$0xff]  ;;  %v321_v11 = vld [vmem:[%s1702_s15 + $0xb0] sm:$0xff] }
  0x18   : > { %310 = vst [vmem:[%s1707_s16 + $0x28] sm:$0xff] %v309_v5  ;;  %v323_v12 = vld [vmem:[%s1702_s15 + $0xc0] sm:$0xff]  ;;  %v325_v13 = vld [vmem:[%s1702_s15 + $0xd0] sm:$0xff] }
  0x19   : > { %312 = vst [vmem:[%s1707_s16 + $0x30] sm:$0xff] %v311_v6  ;;  %v327_v14 = vld [vmem:[%s1702_s15 + $0xe0] sm:$0xff]  ;;  %v329_v15 = vld [vmem:[%s1702_s15 + $0xf0] sm:$0xff] }
  0x1a   : > { %314 = vst [vmem:[%s1707_s16 + $0x38] sm:$0xff] %v313_v7  ;;  %v331_v16 = vld [vmem:[%s1702_s15 + $0x100] sm:$0xff]  ;;  %v333_v17 = vld [vmem:[%s1702_s15 + $0x110] sm:$0xff] }
  0x1b   : > { %316 = vst [vmem:[%s1707_s16 + $0x40] sm:$0xff] %v315_v8 }
  0x1c   : > { %318 = vst [vmem:[%s1707_s16 + $0x48] sm:$0xff] %v317_v9 }
  0x1d   : > { %320 = vst [vmem:[%s1707_s16 + $0x50] sm:$0xff] %v319_v10 }
  0x1e   : > { %322 = vst [vmem:[%s1707_s16 + $0x58] sm:$0xff] %v321_v11 }
  0x1f   : > { %324 = vst [vmem:[%s1707_s16 + $0x60] sm:$0xff] %v323_v12 }
  0x20   : > { %326 = vst [vmem:[%s1707_s16 + $0x68] sm:$0xff] %v325_v13 }
  0x21   : > { %328 = vst [vmem:[%s1707_s16 + $0x70] sm:$0xff] %v327_v14 }
  0x22   : > { %330 = vst [vmem:[%s1707_s16 + $0x78] sm:$0xff] %v329_v15 }
  0x23   : > { %332 = vst [vmem:[%s1707_s16 + $0x80] sm:$0xff] %v331_v16 }
  0x24   : > { %334 = vst [vmem:[%s1707_s16 + $0x88] sm:$0xff] %v333_v17 }
  0x25 PF: > { %p1401_p7 = scmp.ge.s32.totalorder %s1619_s26, 1  ;;  %p339_p8 = scmp.lt.s32.totalorder %s1619_s26, 3 }
  0x27   : > { %p340_p9 = pnand %p1401_p7, %p339_p8 }
  0x28   : > { %s346_s21 = sand.u32 (!%p340_p9), 1, %s1611_s24  }
  0x29   : > { %343 = sbr.rel (%p340_p9) target bundleno = 548 (0x224), region = 82 }
  0x2a   : > { %s1568_s14 = smul.u32 (!%p340_p9), 144, %s346_s21 }
  0x2c   : > { %s1858_s12 = scalar_lea.vmem (!%p340_p9), [#allocation3], %s1568_s14 }
  0x2e   : > { %v1434_v18 = vld [vmem:[%s2364_s1 + $0xf8] sm:$0xff]  ;;  %v1433_v19 = vld [vmem:[%s2364_s1 + $0xf0] sm:$0xff]  ;;  %v1432_v20 = vld [vmem:[%s2364_s1 + $0xe8] sm:$0xff]  ;;  %s1516_s24 = sshll.u32 (%p1692_p5), %s1396_s27, 3 }
  0x2f   : > { %442 = vmatpush.msra.mxu0 %v1434_v18  ;;  %1519 = vmatpush.msra.mxu3 %v1434_v18  ;;  %v1431_v21 = vld [vmem:[%s2364_s1 + $0xe0] sm:$0xff]  ;;  %v1759_v22 = vld [vmem:[%s2364_s1 + $0x78] sm:$0xff]  ;;  %v1768_v24 = vld [vmem:[%s2364_s1 + $0x70] sm:$0xff]  ;;  %s1246_s9 = scalar_lea.vmem (%p1692_p5), %s2370_s7, %s1516_s24 }
  0x30   : > { %v1430_v23 = vld [vmem:[%s2364_s1 + $0xd8] sm:$0xff]  ;;  %1535 = vmatpush.msra.mxu1 %v1759_v22  ;;  %v1429_v25 = vld [vmem:[%s2364_s1 + $0xd0] sm:$0xff]  ;;  %v1777_v26 = vld [vmem:[%s2364_s1 + $0x68] sm:$0xff] }
  0x31   : > { %443 = vmatpush.msra.mxu0 %v1433_v19  ;;  %1520 = vmatpush.msra.mxu3 %v1433_v19  ;;  %v1428_v27 = vld [vmem:[%s2364_s1 + $0xc8] sm:$0xff]  ;;  %v1786_v28 = vld [vmem:[%s2364_s1 + $0x60] sm:$0xff]  ;;  %v1795_v30 = vld [vmem:[%s2364_s1 + $0x58] sm:$0xff] }
  0x32   : > { %1536 = vmatpush.msra.mxu1 %v1768_v24  ;;  %v1427_v29 = vld [vmem:[%s2364_s1 + $0xc0] sm:$0xff]  ;;  %v1426_v31 = vld [vmem:[%s2364_s1 + $0xb8] sm:$0xff]  ;;  %v1804_v32 = vld [vmem:[%s2364_s1 + $0x50] sm:$0xff] }
  0x33   : > { %444 = vmatpush.msra.mxu0 %v1432_v20  ;;  %1521 = vmatpush.msra.mxu3 %v1432_v20  ;;  %v1425_v33 = vld [vmem:[%s2364_s1 + $0xb0] sm:$0xff]  ;;  %v1813_v34 = vld [vmem:[%s2364_s1 + $0x48] sm:$0xff]  ;;  %v1823_v36 = vld [vmem:[%s2364_s1 + $0x40] sm:$0xff] }
  0x34   : > { %1537 = vmatpush.msra.mxu1 %v1777_v26  ;;  %v1424_v35 = vld [vmem:[%s2364_s1 + $0xa8] sm:$0xff]  ;;  %v1423_v37 = vld [vmem:[%s2364_s1 + $0xa0] sm:$0xff]  ;;  %v1832_v38 = vld [vmem:[%s2364_s1 + $0x38] sm:$0xff] }
  0x35   : > { %445 = vmatpush.msra.mxu0 %v1431_v21  ;;  %1522 = vmatpush.msra.mxu3 %v1431_v21  ;;  %v1422_v39 = vld [vmem:[%s2364_s1 + $0x98] sm:$0xff]  ;;  %v398_v40 = vld [vmem:[%s2364_s1 + $0x30] sm:$0xff]  ;;  %v397_v42 = vld [vmem:[%s2364_s1 + $0x28] sm:$0xff] }
  0x36   : > { %1538 = vmatpush.msra.mxu1 %v1786_v28  ;;  %v1421_v41 = vld [vmem:[%s2364_s1 + $0x90] sm:$0xff]  ;;  %v1420_v43 = vld [vmem:[%s2364_s1 + $0x88] sm:$0xff]  ;;  %v396_v44 = vld [vmem:[%s2364_s1 + $0x20] sm:$0xff] }
  0x37   : > { %446 = vmatpush.msra.mxu0 %v1430_v23  ;;  %1523 = vmatpush.msra.mxu3 %v1430_v23  ;;  %v1419_v45 = vld [vmem:[%s2364_s1 + $0x80] sm:$0xff]  ;;  %v1861_v46 = vld [vmem:[%s1858_s12 + $0x8] sm:$0xff]  ;;  %v394_v48 = vld [vmem:[%s2364_s1 + $0x10] sm:$0xff] }
  0x38   : > { %1539 = vmatpush.msra.mxu1 %v1795_v30  ;;  %v395_v47 = vld [vmem:[%s2364_s1 + $0x18] sm:$0xff]  ;;  %v393_v50 = vld [vmem:[%s2364_s1 + $0x8] sm:$0xff]  ;;  %v1465_v51 = vld [vmem:[%s2364_s1 + $0x170] sm:$0xff] }
  0x39   : > { %447 = vmatpush.msra.mxu0 %v1429_v25  ;;  %1524 = vmatpush.msra.mxu3 %v1429_v25  ;;  %v1466_v49 = vld [vmem:[%s2364_s1 + $0x178] sm:$0xff]  ;;  %v392_v52 = vld [vmem:[%s2364_s1] sm:$0xff]  ;;  %v1464_v53 = vld [vmem:[%s2364_s1 + $0x168] sm:$0xff] }
  0x3a   : > { %1540 = vmatpush.msra.mxu1 %v1804_v32  ;;  %1551 = vmatpush.msra.mxu2 %v1466_v49  ;;  %v1889_v54 = vld [vmem:[%s1858_s12 + $0x10] sm:$0xff]  ;;  %v1892_v55 = vld [vmem:[%s1858_s12 + $0x20] sm:$0xff]  ;;  %v1462_v57 = vld [vmem:[%s2364_s1 + $0x158] sm:$0xff] }
  0x3b   : > { %448 = vmatpush.msra.mxu0 %v1428_v27  ;;  %1525 = vmatpush.msra.mxu3 %v1428_v27  ;;  %v1463_v56 = vld [vmem:[%s2364_s1 + $0x160] sm:$0xff]  ;;  %v1461_v58 = vld [vmem:[%s2364_s1 + $0x150] sm:$0xff]  ;;  %v1460_v59 = vld [vmem:[%s2364_s1 + $0x148] sm:$0xff] }
  0x3c   : > { %1541 = vmatpush.msra.mxu1 %v1813_v34  ;;  %1552 = vmatpush.msra.mxu2 %v1465_v51  ;;  %v1913_v60 = vld [vmem:[%s1858_s12 + $0x18] sm:$0xff]  ;;  %v1459_v61 = vld [vmem:[%s2364_s1 + $0x140] sm:$0xff]  ;;  %v1457_v63 = vld [vmem:[%s2364_s1 + $0x130] sm:$0xff] }
  0x3d   : > { %449 = vmatpush.msra.mxu0 %v1427_v29  ;;  %1526 = vmatpush.msra.mxu3 %v1427_v29  ;;  %v1458_v62 = vld [vmem:[%s2364_s1 + $0x138] sm:$0xff]  ;;  %v1456_v0 = vld [vmem:[%s2364_s1 + $0x128] sm:$0xff]  ;;  %v1455_v1 = vld [vmem:[%s2364_s1 + $0x120] sm:$0xff] }
  0x3e   : > { %1542 = vmatpush.msra.mxu1 %v1823_v36  ;;  %1553 = vmatpush.msra.mxu2 %v1464_v53  ;;  %v1454_v2 = vld [vmem:[%s2364_s1 + $0x118] sm:$0xff]  ;;  %v1453_v3 = vld [vmem:[%s2364_s1 + $0x110] sm:$0xff]  ;;  %v1452_v4 = vld [vmem:[%s2364_s1 + $0x108] sm:$0xff] }
  0x3f   : > { %450 = vmatpush.msra.mxu0 %v1426_v31  ;;  %1527 = vmatpush.msra.mxu3 %v1426_v31  ;;  %v376_v5 = vld [vmem:[%s1858_s12] sm:$0xff]  ;;  %v1950_v7 = vld [vmem:[%s1858_s12 + $0x28] sm:$0xff]  ;;  %v1956_v8 = vld [vmem:[%s1858_s12 + $0x30] sm:$0xff] }
  0x40   : > { %1543 = vmatpush.msra.mxu1 %v1832_v38  ;;  %1554 = vmatpush.msra.mxu2 %v1463_v56  ;;  %v1451_v6 = vld [vmem:[%s2364_s1 + $0x100] sm:$0xff]  ;;  %v1482_v9 = vld [vmem:[%s2366_s3 + $0xf8] sm:$0xff]  ;;  %v1481_v11 = vld [vmem:[%s2366_s3 + $0xf0] sm:$0xff] }
  0x41   : > { %451 = vmatpush.msra.mxu0 %v1425_v33  ;;  %1528 = vmatpush.msra.mxu3 %v1425_v33  ;;  %v1120_v10 = vld [vmem:[%s2368_s5 + $0x78] sm:$0xff]  ;;  %v1119_v13 = vld [vmem:[%s2368_s5 + $0x70] sm:$0xff]  ;;  %v1480_v14 = vld [vmem:[%s2366_s3 + $0xe8] sm:$0xff] }
  0x42   : > { %1544 = vmatpush.msra.mxu1 %v398_v40  ;;  %1555 = vmatpush.msra.mxu2 %v1462_v57  ;;  %v1498_v12 = vld [vmem:[%s2366_s3 + $0x178] sm:$0xff]  ;;  %v1118_v15 = vld [vmem:[%s2368_s5 + $0x68] sm:$0xff]  ;;  %v1497_v16 = vld [vmem:[%s2366_s3 + $0x170] sm:$0xff] }
  0x43   : > { %452 = vmatpush.msra.mxu0 %v1424_v35  ;;  %1529 = vmatpush.msra.mxu3 %v1424_v35  ;;  %v1985_v17 = vld [vmem:[%s1858_s12 + $0x38] sm:$0xff]  ;;  %v1479_v18 = vld [vmem:[%s2366_s3 + $0xe0] sm:$0xff]  ;;  %v2011_v23 = vld [vmem:[%s1858_s12 + $0x48] sm:$0xff] }
  0x44   : > { %1545 = vmatpush.msra.mxu1 %v397_v42  ;;  %1556 = vmatpush.msra.mxu2 %v1461_v58  ;;  %v1496_v19 = vld [vmem:[%s2366_s3 + $0x168] sm:$0xff]  ;;  %v1478_v20 = vld [vmem:[%s2366_s3 + $0xd8] sm:$0xff]  ;;  %v1117_v21 = vld [vmem:[%s2368_s5 + $0x60] sm:$0xff] }
  0x45   : > { %453 = vmatpush.msra.mxu0 %v1423_v37  ;;  %1530 = vmatpush.msra.mxu3 %v1423_v37  ;;  %v1495_v25 = vld [vmem:[%s2366_s3 + $0x160] sm:$0xff]  ;;  %v2031_v27 = vld [vmem:[%s1858_s12 + $0x58] sm:$0xff]  ;;  %v1115_v31 = vld [vmem:[%s2368_s5 + $0x50] sm:$0xff] }
  0x46   : > { %1546 = vmatpush.msra.mxu1 %v396_v44  ;;  %1557 = vmatpush.msra.mxu2 %v1460_v59  ;;  %v1494_v29 = vld [vmem:[%s2366_s3 + $0x158] sm:$0xff]  ;;  %v1493_v33 = vld [vmem:[%s2366_s3 + $0x150] sm:$0xff]  ;;  %v1114_v35 = vld [vmem:[%s2368_s5 + $0x48] sm:$0xff] }
  0x47   : > { %454 = vmatpush.msra.mxu0 %v1422_v39  ;;  %1531 = vmatpush.msra.mxu3 %v1422_v39  ;;  %v2067_v37 = vld [vmem:[%s1858_s12 + $0x68] sm:$0xff]  ;;  %v1113_v39 = vld [vmem:[%s2368_s5 + $0x40] sm:$0xff] }
  0x48   : > { %1547 = vmatpush.msra.mxu1 %v395_v47  ;;  %1558 = vmatpush.msra.mxu2 %v1459_v61 }
  0x49   : > { %455 = vmatpush.msra.mxu0 %v1421_v41  ;;  %1532 = vmatpush.msra.mxu3 %v1421_v41  ;;  %v1473_v41 = vld [vmem:[%s2366_s3 + $0xb0] sm:$0xff] }
  0x4a   : > { %1548 = vmatpush.msra.mxu1 %v394_v48  ;;  %1559 = vmatpush.msra.mxu2 %v1458_v62 }
  0x4b   : > { %456 = vmatpush.msra.mxu0 %v1420_v43  ;;  %1533 = vmatpush.msra.mxu3 %v1420_v43  ;;  %v1112_v43 = vld [vmem:[%s2368_s5 + $0x38] sm:$0xff] }
  0x4c   : > { %1549 = vmatpush.msra.mxu1 %v393_v50  ;;  %1560 = vmatpush.msra.mxu2 %v1457_v63 }
  0x4d   : > { %457 = vmatpush.msra.mxu0 %v1419_v45  ;;  %1534 = vmatpush.msra.mxu3 %v1419_v45  ;;  %v774_v45 = vld [vmem:[%s2366_s3 + $0x78] sm:$0xff] }
  0x4e   : > { %458 = vmatmul.f32.vlgmr.msra.gmra.mxu0 %v1861_v46  ;;  %1550 = vmatpush.msra.mxu1 %v392_v52 }
  0x4f   : > { %507 = vmatpush.msrb.mxu0 %v1759_v22  ;;  %535 = vmatmul.f32.vlgmr.msra.gmra.mxu1 %v1892_v55  ;;  %v2004_v22 = vld [vmem:[%s1858_s12 + $0x40] sm:$0xff] }
  0x50   : > { %1561 = vmatpush.msra.mxu2 %v1456_v0  ;;  %470 = vmatmul.f32.vlgmr.msra.gmra.mxu3 %v1950_v7 }
  0x51   : > { %508 = vmatpush.msrb.mxu0 %v1768_v24  ;;  %808 = vmatpush.msrb.mxu3 %v1482_v9  ;;  %v2018_v24 = vld [vmem:[%s1858_s12 + $0x50] sm:$0xff] }
  0x52   : > { %1562 = vmatpush.msra.mxu2 %v1455_v1  ;;  %972 = vmatpush.msrb.mxu1 %v1498_v12  ;;  %v1487_v9 = vld [vmem:[%s2366_s3 + $0x120] sm:$0xff]  ;;  %v1450_v12 = vld [vmem:[%s1858_s12 + $0x88] sm:$0xff] }
  0x53   : > { %509 = vmatpush.msrb.mxu0 %v1777_v26  ;;  %809 = vmatpush.msrb.mxu3 %v1481_v11  ;;  %v1477_v26 = vld [vmem:[%s2366_s3 + $0xd0] sm:$0xff]  ;;  %v764_v11 = vld [vmem:[%s2366_s3 + $0x28] sm:$0xff] }
  0x54   : > { %1563 = vmatpush.msra.mxu2 %v1454_v2  ;;  %973 = vmatpush.msrb.mxu1 %v1497_v16  ;;  %v763_v16 = vld [vmem:[%s2366_s3 + $0x20] sm:$0xff] }
  0x55   : > { %510 = vmatpush.msrb.mxu0 %v1786_v28  ;;  %810 = vmatpush.msrb.mxu3 %v1480_v14  ;;  %v1116_v28 = vld [vmem:[%s2368_s5 + $0x58] sm:$0xff] }
  0x56   : > { %461 = vmatmul.f32.gmra.mxu0 %v1889_v54  ;;  %1564 = vmatpush.msra.mxu2 %v1453_v3  ;;  %v1108_v14 = vld [vmem:[%s2368_s5 + $0x18] sm:$0xff] }
  0x57   : > { %511 = vmatpush.msrb.mxu0 %v1795_v30  ;;  %538 = vmatmul.f32.gmra.mxu1 %v1950_v7  ;;  %v1476_v30 = vld [vmem:[%s2366_s3 + $0xc8] sm:$0xff] }
  0x58   : > { %1565 = vmatpush.msra.mxu2 %v1452_v4  ;;  %473 = vmatmul.f32.gmra.mxu3 %v1956_v8 }
  0x59   : > { %512 = vmatpush.msrb.mxu0 %v1804_v32  ;;  %811 = vmatpush.msrb.mxu3 %v1479_v18  ;;  %v2049_v32 = vld [vmem:[%s1858_s12 + $0x60] sm:$0xff]  ;;  %v762_v18 = vld [vmem:[%s2366_s3 + $0x18] sm:$0xff] }
  0x5a   : > { %1566 = vmatpush.msra.mxu2 %v1451_v6  ;;  %974 = vmatpush.msrb.mxu1 %v1496_v19 }
  0x5b   : > { %513 = vmatpush.msrb.mxu0 %v1813_v34  ;;  %634 = vmatmul.f32.vlgmr.msra.gmra.mxu2 %v1956_v8  ;;  %v1475_v34 = vld [vmem:[%s2366_s3 + $0xc0] sm:$0xff] }
  0x5c   : > { %1125 = vmatpush.msrb.mxu2 %v1120_v10  ;;  %812 = vmatpush.msrb.mxu3 %v1478_v20  ;;  %v765_v10 = vld [vmem:[%s2366_s3 + $0x30] sm:$0xff] }
  0x5d   : > { %514 = vmatpush.msrb.mxu0 %v1823_v36  ;;  %975 = vmatpush.msrb.mxu1 %v1495_v25  ;;  %v1492_v36 = vld [vmem:[%s2366_s3 + $0x148] sm:$0xff]  ;;  %v761_v20 = vld [vmem:[%s2366_s3 + $0x10] sm:$0xff] }
  0x5e   : > { %464 = vmatmul.f32.gmra.mxu0 %v1913_v60  ;;  %1126 = vmatpush.msrb.mxu2 %v1119_v13  ;;  %v1469_v13 = vld [vmem:[%s2366_s3 + $0x90] sm:$0xff] }
  0x5f   : > { %515 = vmatpush.msrb.mxu0 %v1832_v38  ;;  %541 = vmatmul.f32.gmra.mxu1 %v1956_v8  ;;  %v1474_v38 = vld [vmem:[%s2366_s3 + $0xb8] sm:$0xff]  ;;  %v1107_v25 = vld [vmem:[%s2368_s5 + $0x10] sm:$0xff] }
  0x60   : > { %1127 = vmatpush.msrb.mxu2 %v1118_v15  ;;  %476 = vmatmul.f32.gmra.mxu3 %v1985_v17  ;;  %v1486_v15 = vld [vmem:[%s2366_s3 + $0x118] sm:$0xff] }
  0x61   : > { %516 = vmatpush.msrb.mxu0 %v398_v40  ;;  %813 = vmatpush.msrb.mxu3 %v1477_v26  ;;  %v1491_v40 = vld [vmem:[%s2366_s3 + $0x140] sm:$0xff]  ;;  %v760_v26 = vld [vmem:[%s2366_s3 + $0x8] sm:$0xff] }
  0x62   : > { %1128 = vmatpush.msrb.mxu2 %v1117_v21  ;;  %976 = vmatpush.msrb.mxu1 %v1494_v29  ;;  %v1468_v21 = vld [vmem:[%s2366_s3 + $0x88] sm:$0xff]  ;;  %v759_v29 = vld [vmem:[%s2366_s3] sm:$0xff] }
  0x63   : > { %517 = vmatpush.msrb.mxu0 %v397_v42  ;;  %637 = vmatmul.f32.gmra.mxu2 %v1985_v17  ;;  %v2085_v42 = vld [vmem:[%s1858_s12 + $0x70] sm:$0xff] }
  0x64   : > { %1129 = vmatpush.msrb.mxu2 %v1116_v28  ;;  %814 = vmatpush.msrb.mxu3 %v1476_v30  ;;  %v1485_v28 = vld [vmem:[%s2366_s3 + $0x110] sm:$0xff] }
  0x65   : > { %518 = vmatpush.msrb.mxu0 %v396_v44  ;;  %977 = vmatpush.msrb.mxu1 %v1493_v33  ;;  %v1490_v44 = vld [vmem:[%s2366_s3 + $0x138] sm:$0xff]  ;;  %v1467_v33 = vld [vmem:[%s2366_s3 + $0x80] sm:$0xff] }
  0x66   : > { %467 = vmatmul.f32.gmra.mxu0 %v1892_v55  ;;  %1130 = vmatpush.msrb.mxu2 %v1115_v31  ;;  %v1621_v31 = vmov 0.0  }
  0x67   : > { %519 = vmatpush.msrb.mxu0 %v395_v47  ;;  %544 = vmatmul.f32.gmra.mxu1 %v1985_v17 }
  0x68   : > { %479 = vmatmul.f32.gmra.mxu3 %v2004_v22  ;;  %1131 = vmatpush.msrb.mxu2 %v1114_v35  ;;  %v1484_v35 = vld [vmem:[%s2366_s3 + $0x108] sm:$0xff] }
  0x69   : > { %520 = vmatpush.msrb.mxu0 %v394_v48  ;;  %815 = vmatpush.msrb.mxu3 %v1475_v34  ;;  %v773_v48 = vld [vmem:[%s2366_s3 + $0x70] sm:$0xff]  ;;  %v1106_v34 = vld [vmem:[%s2368_s5 + $0x8] sm:$0xff] }
  0x6a   : > { %978 = vmatpush.msrb.mxu1 %v1492_v36  ;;  %1132 = vmatpush.msrb.mxu2 %v1113_v39  ;;  %v1105_v36 = vld [vmem:[%s2368_s5] sm:$0xff] }
  0x6b   : > { %521 = vmatpush.msrb.mxu0 %v393_v50  ;;  %640 = vmatmul.f32.gmra.mxu2 %v2004_v22  ;;  %v1111_v50 = vld [vmem:[%s2368_s5 + $0x30] sm:$0xff]  ;;  %v1483_v39 = vld [vmem:[%s2366_s3 + $0x100] sm:$0xff] }
  0x6c   : > { %816 = vmatpush.msrb.mxu3 %v1474_v38  ;;  %979 = vmatpush.msrb.mxu1 %v1491_v40 }
  0x6d   : > { %522 = vmatpush.msrb.mxu0 %v392_v52  ;;  %1133 = vmatpush.msrb.mxu2 %v1112_v43  ;;  %v2114_v52 = vld [vmem:[%s1858_s12 + $0x78] sm:$0xff] }
  0x6e   : > { %523 = vmatmul.f32.vlgmr.msrb.gmra.mxu0 %v376_v5  ;;  %817 = vmatpush.msrb.mxu3 %v1473_v41  ;;  %v766_v5 = vld [vmem:[%s2366_s3 + $0x38] sm:$0xff] }
  0x6f   : > { %606 = vmatpush.msra.mxu0 %v1466_v49  ;;  %547 = vmatmul.f32.gmra.mxu1 %v2004_v22  ;;  %v1472_v49 = vld [vmem:[%s2366_s3 + $0xa8] sm:$0xff] }
  0x70   : > { %482 = vmatmul.f32.gmra.mxu3 %v2011_v23  ;;  %980 = vmatpush.msrb.mxu1 %v1490_v44 }
  0x71   : > { %607 = vmatpush.msra.mxu0 %v1465_v51  ;;  %818 = vmatpush.msrb.mxu3 %v1472_v49  ;;  %v772_v51 = vld [vmem:[%s2366_s3 + $0x68] sm:$0xff] }
  0x72   : > { %1134 = vmatpush.msrb.mxu2 %v1111_v50 }
  0x73   : > { %608 = vmatpush.msra.mxu0 %v1464_v53  ;;  %643 = vmatmul.f32.gmra.mxu2 %v2011_v23  ;;  %v1489_v53 = vld [vmem:[%s2366_s3 + $0x130] sm:$0xff] }
  0x74   : > { %981 = vmatpush.msrb.mxu1 %v1489_v53 }
  0x75   : > { %609 = vmatpush.msra.mxu0 %v1463_v56  ;;  %v771_v56 = vld [vmem:[%s2366_s3 + $0x60] sm:$0xff] }
  0x76   : > { %526 = vmatmul.f32.gmra.mxu0 %v1861_v46 }
  0x77   : > { %610 = vmatpush.msra.mxu0 %v1462_v57  ;;  %550 = vmatmul.f32.gmra.mxu1 %v2011_v23  ;;  %v770_v57 = vld [vmem:[%s2366_s3 + $0x58] sm:$0xff] }
  0x78   : > { %485 = vmatmul.f32.gmra.mxu3 %v2018_v24 }
  0x79   : > { %611 = vmatpush.msra.mxu0 %v1461_v58 }
  0x7b   : > { %612 = vmatpush.msra.mxu0 %v1460_v59  ;;  %646 = vmatmul.f32.gmra.mxu2 %v2018_v24  ;;  %v1471_v59 = vld [vmem:[%s2366_s3 + $0xa0] sm:$0xff] }
  0x7c   : > { %819 = vmatpush.msrb.mxu3 %v1471_v59 }
  0x7d   : > { %613 = vmatpush.msra.mxu0 %v1459_v61  ;;  %v1110_v61 = vld [vmem:[%s2368_s5 + $0x28] sm:$0xff] }
  0x7e   : > { %529 = vmatmul.f32.gmra.mxu0 %v1889_v54  ;;  %1135 = vmatpush.msrb.mxu2 %v1110_v61 }
  0x7f   : > { %614 = vmatpush.msra.mxu0 %v1458_v62  ;;  %553 = vmatmul.f32.gmra.mxu1 %v2018_v24  ;;  %v769_v62 = vld [vmem:[%s2366_s3 + $0x50] sm:$0xff] }
  0x80   : > { %488 = vmatmul.f32.gmra.mxu3 %v2031_v27 }
  0x81   : > { %615 = vmatpush.msra.mxu0 %v1457_v63  ;;  %v1488_v63 = vld [vmem:[%s2366_s3 + $0x128] sm:$0xff] }
  0x82   : > { %982 = vmatpush.msrb.mxu1 %v1488_v63 }
  0x83   : > { %616 = vmatpush.msra.mxu0 %v1456_v0  ;;  %649 = vmatmul.f32.gmra.mxu2 %v2031_v27  ;;  %v768_v0 = vld [vmem:[%s2366_s3 + $0x48] sm:$0xff] }
  0x84   : > { %983 = vmatpush.msrb.mxu1 %v1487_v9 }
  0x85   : > { %617 = vmatpush.msra.mxu0 %v1455_v1  ;;  %v2146_v1 = vld [vmem:[%s1858_s12 + $0x80] sm:$0xff]  ;;  %s1402_s12 = sshll.u32 %s346_s21, 7 }
  0x86   : > { %532 = vmatmul.f32.gmra.mxu0 %v1913_v60  ;;  %984 = vmatpush.msrb.mxu1 %v1486_v15  ;;  %s2282_s14 = scalar_lea.vmem [#allocation4], %s1402_s12 }
  0x87   : > { %618 = vmatpush.msra.mxu0 %v1454_v2  ;;  %556 = vmatmul.f32.gmra.mxu1 %v2031_v27  ;;  %v1470_v2 = vld [vmem:[%s2366_s3 + $0x98] sm:$0xff] }
  0x88   : > { %491 = vmatmul.f32.gmra.mxu3 %v2049_v32  ;;  %985 = vmatpush.msrb.mxu1 %v1485_v28 }
  0x89   : > { %619 = vmatpush.msra.mxu0 %v1453_v3  ;;  %v1109_v3 = vld [vmem:[%s2368_s5 + $0x20] sm:$0xff]  ;;  %820 = vmatpush.msrb.mxu3 %v1470_v2 }
  0x8a   : > { %1136 = vmatpush.msrb.mxu2 %v1109_v3  ;;  %986 = vmatpush.msrb.mxu1 %v1484_v35 }
  0x8b   : > { %620 = vmatpush.msra.mxu0 %v1452_v4  ;;  %652 = vmatmul.f32.gmra.mxu2 %v2049_v32  ;;  %v767_v4 = vld [vmem:[%s2366_s3 + $0x40] sm:$0xff] }
  0x8c   : > { %821 = vmatpush.msrb.mxu3 %v1469_v13  ;;  %1137 = vmatpush.msrb.mxu2 %v1108_v14 }
  0x8d   : > { %621 = vmatpush.msra.mxu0 %v1451_v6  ;;  %987 = vmatpush.msrb.mxu1 %v1483_v39 }
  0x8e   : > { %622 = vmatmul.f32.vlgmr.msra.gmra.mxu0 %v1889_v54  ;;  %822 = vmatpush.msrb.mxu3 %v1468_v21 }
  0x8f   : > { %559 = vmatmul.f32.gmra.mxu1 %v2049_v32  ;;  %873 = vmatpush.msrb.mxu0 %v774_v45 }
  0x90   : > { %494 = vmatmul.f32.gmra.mxu3 %v2067_v37  ;;  %1138 = vmatpush.msrb.mxu2 %v1107_v25 }
  0x91   : > { %874 = vmatpush.msrb.mxu0 %v773_v48  ;;  %823 = vmatpush.msrb.mxu3 %v1467_v33  ;;  %v2233_v48 = vld [vmem:[%s2365_s2] ss:$0 sm:$0xff] }
  0x92   : > { %1139 = vmatpush.msrb.mxu2 %v1106_v34 }
  0x93   : > { %655 = vmatmul.f32.gmra.mxu2 %v2067_v37  ;;  %875 = vmatpush.msrb.mxu0 %v772_v51 }
  0x94   : > { %1140 = vmatpush.msrb.mxu2 %v1105_v36 }
  0x95   : > { %876 = vmatpush.msrb.mxu0 %v771_v56 }
  0x96   : > { %625 = vmatmul.f32.gmra.mxu0 %v1913_v60 }
  0x97   : > { %562 = vmatmul.f32.gmra.mxu1 %v2067_v37  ;;  %877 = vmatpush.msrb.mxu0 %v770_v57 }
  0x98   : > { %497 = vmatmul.f32.gmra.mxu3 %v2085_v42 }
  0x99   : > { %878 = vmatpush.msrb.mxu0 %v769_v62 }
  0x9b   : > { %658 = vmatmul.f32.gmra.mxu2 %v2085_v42  ;;  %879 = vmatpush.msrb.mxu0 %v768_v0 }
  0x9d   : > { %880 = vmatpush.msrb.mxu0 %v767_v4 }
  0x9e   : > { %628 = vmatmul.f32.gmra.mxu0 %v1892_v55 }
  0x9f   : > { %565 = vmatmul.f32.gmra.mxu1 %v2085_v42  ;;  %881 = vmatpush.msrb.mxu0 %v766_v5 }
  0xa0   : > { %500 = vmatmul.f32.gmra.mxu3 %v2114_v52 }
  0xa1   : > { %882 = vmatpush.msrb.mxu0 %v765_v10 }
  0xa3   : > { %661 = vmatmul.f32.gmra.mxu2 %v2114_v52  ;;  %883 = vmatpush.msrb.mxu0 %v764_v11 }
  0xa5   : > { %884 = vmatpush.msrb.mxu0 %v763_v16 }
  0xa6   : > { %631 = vmatmul.f32.gmra.mxu0 %v1950_v7 }
  0xa7   : > { %568 = vmatmul.f32.gmra.mxu1 %v2114_v52  ;;  %885 = vmatpush.msrb.mxu0 %v762_v18 }
  0xa8   : > { %503 = vmatmul.f32.gmra.mxu3 %v2146_v1 }
  0xa9   : > { %886 = vmatpush.msrb.mxu0 %v761_v20 }
  0xab   : > { %664 = vmatmul.f32.gmra.mxu2 %v2146_v1  ;;  %887 = vmatpush.msrb.mxu0 %v760_v26 }
  0xad   : > { %888 = vmatpush.msrb.mxu0 %v759_v29 }
  0xae   : > { %889 = vmatmul.f32.vlgmr.msrb.gmra.mxu0 %v1621_v31 }
  0xb3   : > { %667 = vmatmul.f32.gmra.mxu2 %v1450_v12 }
  0xbb   : > { %1141 = vmatmul.f32.vlgmr.msrb.gmra.mxu2 %v1861_v46 }
  0xc3   : > { %1144 = vmatmul.f32.gmra.mxu2 %v1889_v54 }
  0xcb   : > { %v2099_v47 = vpop.f32.mrf.mxu0  ;;  %1147 = vmatmul.f32.gmra.mxu2 %v1913_v60 }
  0xcc   : > { %v536_v44 = vpop.f32.mrf.mxu1 }
  0xd3   : > { %v2128_v58 = vpop.f32.mrf.mxu0  ;;  %v471_v43 = vpop.f32.mrf.mxu3  ;;  %1150 = vmatmul.f32.gmra.mxu2 %v1892_v55 }
  0xd4   : > { %v539_v56 = vpop.f32.mrf.mxu1  ;;  %v537_v9 = vadd.f32 %v536_v44, %v471_v43 }
  0xdb   : > { %v2163_v6 = vpop.f32.mrf.mxu0  ;;  %v474_v60 = vpop.f32.mrf.mxu3  ;;  %1153 = vmatmul.f32.gmra.mxu2 %v1950_v7 }
  0xdc   : > { %v542_v3 = vpop.f32.mrf.mxu1  ;;  %v540_v18 = vadd.f32 %v539_v56, %v474_v60 }
  0xde   : > { %v635_v49 = vpop.f32.mrf.mxu2 }
  0xdf   : > { %v675_v13 = vadd.f32 %v635_v49, %v537_v9 }
  0xe1   : > { %v695_v16 = vadd.f32 %v2233_v48, %v675_v13 }
  0xe3   : > { %v2190_v19 = vpop.f32.mrf.mxu0  ;;  %1156 = vmatmul.f32.gmra.mxu2 %v1956_v8  ;;  %v477_v2 = vpop.f32.mrf.mxu3 }
  0xe4   : > { %v545_v14 = vpop.f32.mrf.mxu1  ;;  %v543_v28 = vadd.f32 %v542_v3, %v477_v2 }
  0xe6   : > { %v638_v57 = vpop.f32.mrf.mxu2 }
  0xe7   : > { %v676_v20 = vadd.f32 %v638_v57, %v540_v18 }
  0xeb   : > { %v524_v30 = vpop.f32.mrf.mxu0  ;;  %1159 = vmatmul.f32.gmra.mxu2 %v1985_v17  ;;  %v480_v8 = vpop.f32.mrf.mxu3  ;;  %v696_v17 = vadd.f32 %v2233_v48, %v676_v20 }
  0xec   : > { %v525_v45 = vadd.f32 %v524_v30, %v2099_v47  ;;  %v548_v26 = vpop.f32.mrf.mxu1  ;;  %v546_v34 = vadd.f32 %v545_v14, %v480_v8 }
  0xed   : > { %v712_v29 = vmax.f32 %v696_v17, 0.0 }
  0xee   : > { %v641_v0 = vpop.f32.mrf.mxu2 }
  0xef   : > { %v677_v30 = vadd.f32 %v641_v0, %v543_v28 }
  0xf3   : > { %v527_v38 = vpop.f32.mrf.mxu0  ;;  %1162 = vmatmul.f32.gmra.mxu2 %v2004_v22  ;;  %v483_v25 = vpop.f32.mrf.mxu3  ;;  %v697_v22 = vadd.f32 %v2233_v48, %v677_v30 }
  0xf4   : > { %v528_v53 = vadd.f32 %v527_v38, %v2128_v58  ;;  %v551_v36 = vpop.f32.mrf.mxu1 }
  0xf5   : > { %v713_v38 = vmax.f32 %v697_v22, 0.0 }
  0xf6   : > { %v644_v11 = vpop.f32.mrf.mxu2 }
  0xf7   : > { %v678_v39 = vadd.f32 %v644_v11, %v546_v34 }
  0xfb   : > { %v530_v40 = vpop.f32.mrf.mxu0  ;;  %1165 = vmatmul.f32.gmra.mxu2 %v2011_v23  ;;  %v486_v35 = vpop.f32.mrf.mxu3  ;;  %v549_v23 = vadd.f32 %v548_v26, %v483_v25 }
  0xfc   : > { %v531_v63 = vadd.f32 %v530_v40, %v2163_v6  ;;  %v698_v40 = vadd.f32 %v2233_v48, %v678_v39  ;;  %v554_v44 = vpop.f32.mrf.mxu1 }
  0xfe   : > { %v647_v21 = vpop.f32.mrf.mxu2 }
 0x103   : > { %v533_v41 = vpop.f32.mrf.mxu0  ;;  %1168 = vmatmul.f32.gmra.mxu2 %v2018_v24  ;;  %v489_v43 = vpop.f32.mrf.mxu3  ;;  %v552_v24 = vadd.f32 %v551_v36, %v486_v35 }
 0x104   : > { %v534_v7 = vadd.f32 %v533_v41, %v2190_v19  ;;  %v711_v19 = vmax.f32 %v695_v16, 0.0  ;;  %v557_v60 = vpop.f32.mrf.mxu1  ;;  %v555_v56 = vadd.f32 %v554_v44, %v489_v43 }
 0x106   : > { %v650_v33 = vpop.f32.mrf.mxu2 }
 0x10b   : > { %v623_v46 = vpop.f32.mrf.mxu0  ;;  %1171 = vmatmul.f32.gmra.mxu2 %v2031_v27 }
 0x10c   : > { %v671_v50 = vadd.f32 %v623_v46, %v525_v45  ;;  %v714_v45 = vmax.f32 %v698_v40, 0.0  ;;  %v679_v46 = vadd.f32 %v647_v21, %v549_v23 }
 0x10e   : > { %v691_v51 = vadd.f32 %v2233_v48, %v671_v50  ;;  %v653_v41 = vpop.f32.mrf.mxu2  ;;  %v699_v49 = vadd.f32 %v2233_v48, %v679_v46 }
 0x10f   : > { %v681_v57 = vadd.f32 %v653_v41, %v555_v56 }
 0x110   : > { %v707_v54 = vmax.f32 %v691_v51, 0.0  ;;  %v715_v51 = vmax.f32 %v699_v49, 0.0 }
 0x112   : > { %824 = vmatmul.f32.vlgmr.msrb.gmra.mxu3 %v707_v54  ;;  %892 = vmatmul.f32.gmra.mxu0 %v707_v54  ;;  %v680_v54 = vadd.f32 %v650_v33, %v552_v24 }
 0x113   : > { %v626_v47 = vpop.f32.mrf.mxu0  ;;  %1174 = vmatmul.f32.gmra.mxu2 %v2049_v32  ;;  %v701_v32 = vadd.f32 %v2233_v48, %v681_v57 }
 0x114   : > { %v672_v59 = vadd.f32 %v626_v47, %v528_v53  ;;  %v492_v53 = vpop.f32.mrf.mxu3  ;;  %v700_v27 = vadd.f32 %v2233_v48, %v680_v54 }
 0x116   : > { %v692_v61 = vadd.f32 %v2233_v48, %v672_v59  ;;  %v656_v50 = vpop.f32.mrf.mxu2  ;;  %v716_v47 = vmax.f32 %v700_v27, 0.0 }
 0x118   : > { %v708_v62 = vmax.f32 %v692_v61, 0.0 }
 0x11a   : > { %827 = vmatmul.f32.gmra.mxu3 %v708_v62  ;;  %895 = vmatmul.f32.gmra.mxu0 %v708_v62 }
 0x11b   : > { %988 = vmatmul.f32.vlgmr.msrb.gmra.mxu1 %v708_v62  ;;  %v629_v55 = vpop.f32.mrf.mxu0  ;;  %1177 = vmatmul.f32.gmra.mxu2 %v2067_v37  ;;  %v560_v62 = vpop.f32.mrf.mxu1 }
 0x11c   : > { %v673_v58 = vadd.f32 %v629_v55, %v531_v63  ;;  %v495_v61 = vpop.f32.mrf.mxu3  ;;  %v558_v63 = vadd.f32 %v557_v60, %v492_v53  ;;  %v717_v55 = vmax.f32 %v701_v32, 0.0 }
 0x11d   : > { %v561_v2 = vadd.f32 %v560_v62, %v495_v61 }
 0x11e   : > { %v693_v4 = vadd.f32 %v2233_v48, %v673_v58  ;;  %v659_v59 = vpop.f32.mrf.mxu2  ;;  %v682_v0 = vadd.f32 %v656_v50, %v558_v63 }
 0x120   : > { %v709_v5 = vmax.f32 %v693_v4, 0.0  ;;  %v702_v37 = vadd.f32 %v2233_v48, %v682_v0 }
 0x122   : > { %830 = vmatmul.f32.gmra.mxu3 %v709_v5  ;;  %898 = vmatmul.f32.gmra.mxu0 %v709_v5 }
 0x123   : > { %991 = vmatmul.f32.gmra.mxu1 %v709_v5  ;;  %v632_v6 = vpop.f32.mrf.mxu0  ;;  %1180 = vmatmul.f32.gmra.mxu2 %v2085_v42  ;;  %v563_v4 = vpop.f32.mrf.mxu1  ;;  %v718_v5 = vmax.f32 %v702_v37, 0.0 }
 0x124   : > { %v674_v10 = vadd.f32 %v632_v6, %v534_v7  ;;  %v498_v3 = vpop.f32.mrf.mxu3  ;;  %v683_v7 = vadd.f32 %v659_v59, %v561_v2 }
 0x125   : > { %v564_v42 = vadd.f32 %v563_v4, %v498_v3 }
 0x126   : > { %v694_v12 = vadd.f32 %v2233_v48, %v674_v10  ;;  %v662_v58 = vpop.f32.mrf.mxu2  ;;  %v703_v9 = vadd.f32 %v2233_v48, %v683_v7 }
 0x127   : > { %v684_v13 = vadd.f32 %v662_v58, %v564_v42 }
 0x128   : > { %v710_v15 = vmax.f32 %v694_v12, 0.0  ;;  %v719_v12 = vmax.f32 %v703_v9, 0.0 }
 0x129   : > { %v704_v8 = vadd.f32 %v2233_v48, %v684_v13 }
 0x12a   : > { %833 = vmatmul.f32.gmra.mxu3 %v710_v15  ;;  %901 = vmatmul.f32.gmra.mxu0 %v710_v15 }
 0x12b   : > { %994 = vmatmul.f32.gmra.mxu1 %v710_v15  ;;  %1183 = vmatmul.f32.gmra.mxu2 %v2114_v52  ;;  %v566_v11 = vpop.f32.mrf.mxu1  ;;  %v720_v15 = vmax.f32 %v704_v8, 0.0 }
 0x12c   : > { %v501_v10 = vpop.f32.mrf.mxu3 }
 0x12d   : > { %v567_v52 = vadd.f32 %v566_v11, %v501_v10 }
 0x12e   : > { %v665_v6 = vpop.f32.mrf.mxu2 }
 0x12f   : > { %v685_v16 = vadd.f32 %v665_v6, %v567_v52 }
 0x131   : > { %v705_v20 = vadd.f32 %v2233_v48, %v685_v16 }
 0x132   : > { %836 = vmatmul.f32.gmra.mxu3 %v711_v19  ;;  %904 = vmatmul.f32.gmra.mxu0 %v711_v19 }
 0x133   : > { %997 = vmatmul.f32.gmra.mxu1 %v711_v19  ;;  %1186 = vmatmul.f32.gmra.mxu2 %v2146_v1  ;;  %v569_v19 = vpop.f32.mrf.mxu1  ;;  %v721_v25 = vmax.f32 %v705_v20, 0.0 }
 0x134   : > { %v504_v18 = vpop.f32.mrf.mxu3 }
 0x135   : > { %v570_v1 = vadd.f32 %v569_v19, %v504_v18 }
 0x136   : > { %v668_v14 = vpop.f32.mrf.mxu2 }
 0x137   : > { %v686_v26 = vadd.f32 %v668_v14, %v570_v1 }
 0x139   : > { %v706_v17 = vadd.f32 %v2233_v48, %v686_v26  ;;  %v2276_v48 = vld [vmem:[%s2369_s6] ss:$0 sm:$0xff] }
 0x13a   : > { %839 = vmatmul.f32.gmra.mxu3 %v712_v29  ;;  %907 = vmatmul.f32.gmra.mxu0 %v712_v29 }
 0x13b   : > { %1000 = vmatmul.f32.gmra.mxu1 %v712_v29  ;;  %v890_v29 = vpop.f32.mrf.mxu0  ;;  %v722_v30 = vmax.f32 %v706_v17, 0.0 }
 0x13e   : > { %v1142_v21 = vpop.f32.mrf.mxu2 }
 0x142   : > { %842 = vmatmul.f32.gmra.mxu3 %v713_v38  ;;  %910 = vmatmul.f32.gmra.mxu0 %v713_v38 }
 0x143   : > { %1003 = vmatmul.f32.gmra.mxu1 %v713_v38  ;;  %v2271_v38 = vld [vmem:[%s2367_s4] ss:$0 sm:$0xff] }
 0x146   : > { %v1145_v28 = vpop.f32.mrf.mxu2 }
 0x147   : > { %v1146_v60 = vadd.f32 %v2276_v48, %v1145_v28 }
 0x14a   : > { %845 = vmatmul.f32.gmra.mxu3 %v714_v45  ;;  %913 = vmatmul.f32.gmra.mxu0 %v714_v45 }
 0x14b   : > { %1006 = vmatmul.f32.gmra.mxu1 %v714_v45 }
 0x14e   : > { %v1148_v33 = vpop.f32.mrf.mxu2 }
 0x152   : > { %848 = vmatmul.f32.gmra.mxu3 %v715_v51  ;;  %916 = vmatmul.f32.gmra.mxu0 %v715_v51 }
 0x153   : > { %1009 = vmatmul.f32.gmra.mxu1 %v715_v51 }
 0x156   : > { %v1151_v40 = vpop.f32.mrf.mxu2 }
 0x157   : > { %v1152_v6 = vadd.f32 %v2276_v48, %v1151_v40 }
 0x15a   : > { %851 = vmatmul.f32.gmra.mxu3 %v716_v47  ;;  %919 = vmatmul.f32.gmra.mxu0 %v716_v47 }
 0x15b   : > { %1012 = vmatmul.f32.gmra.mxu1 %v716_v47 }
 0x15e   : > { %v1154_v54 = vpop.f32.mrf.mxu2 }
 0x15f   : > { %v1155_v19 = vadd.f32 %v2276_v48, %v1154_v54 }
 0x162   : > { %854 = vmatmul.f32.gmra.mxu3 %v717_v55  ;;  %922 = vmatmul.f32.gmra.mxu0 %v717_v55 }
 0x163   : > { %1015 = vmatmul.f32.gmra.mxu1 %v717_v55  ;;  %v1149_v55 = vadd.f32 %v2276_v48, %v1148_v33 }
 0x166   : > { %v1157_v0 = vpop.f32.mrf.mxu2 }
 0x16a   : > { %857 = vmatmul.f32.gmra.mxu3 %v718_v5  ;;  %925 = vmatmul.f32.gmra.mxu0 %v718_v5 }
 0x16b   : > { %1018 = vmatmul.f32.gmra.mxu1 %v718_v5 }
 0x16e   : > { %v1160_v13 = vpop.f32.mrf.mxu2 }
 0x172   : > { %860 = vmatmul.f32.gmra.mxu3 %v719_v12  ;;  %928 = vmatmul.f32.gmra.mxu0 %v719_v12 }
 0x173   : > { %1021 = vmatmul.f32.gmra.mxu1 %v719_v12 }
 0x176   : > { %v1163_v28 = vpop.f32.mrf.mxu2 }
 0x17a   : > { %863 = vmatmul.f32.gmra.mxu3 %v720_v15  ;;  %931 = vmatmul.f32.gmra.mxu0 %v720_v15 }
 0x17b   : > { %1024 = vmatmul.f32.gmra.mxu1 %v720_v15 }
 0x182   : > { %866 = vmatmul.f32.gmra.mxu3 %v721_v25  ;;  %934 = vmatmul.f32.gmra.mxu0 %v721_v25 }
 0x183   : > { %1027 = vmatmul.f32.gmra.mxu1 %v721_v25 }
 0x18a   : > { %869 = vmatmul.f32.gmra.mxu3 %v722_v30 }
 0x18b   : > { %1030 = vmatmul.f32.gmra.mxu1 %v722_v30 }
 0x18f   : > { %v893_v22 = vpop.f32.mrf.mxu0 }
 0x193   : > { %1033 = vmatmul.f32.gmra.mxu1 %v1621_v31  ;;  %v1143_v31 = vadd.f32 %v2276_v48, %v1142_v21 }
 0x195   : > { %v825_v34 = vpop.f32.mrf.mxu3 }
 0x196   : > { %v891_v35 = vadd.f32 %v890_v29, %v825_v34 }
 0x197   : > { %v896_v36 = vpop.f32.mrf.mxu0 }
 0x198   : > { %v989_v39 = vpop.f32.mrf.mxu1 }
 0x199   : > { %v1037_v23 = vadd.f32 %v989_v39, %v891_v35 }
 0x19b   : > { %v1057_v41 = vadd.f32 %v2271_v38, %v1037_v23 }
 0x19d   : > { %v1073_v43 = vmax.f32 %v1057_v41, 0.0  ;;  %v828_v44 = vpop.f32.mrf.mxu3 }
 0x19e   : > { %v894_v45 = vadd.f32 %v893_v22, %v828_v44  ;;  %v1158_v22 = vadd.f32 %v2276_v48, %v1157_v0 }
 0x19f   : > { %v1190_v46 = vadd.f32 %v1143_v31, %v1073_v43  ;;  %v899_v49 = vpop.f32.mrf.mxu0  ;;  %v1166_v43 = vpop.f32.mrf.mxu2 }
 0x1a0   : > { %v992_v24 = vpop.f32.mrf.mxu1 }
 0x1a1   : > { %v1206_v50 = vmax.f32 %v1190_v46, 0.0  ;;  %v1038_v51 = vadd.f32 %v992_v24, %v894_v45  ;;  %v1161_v45 = vadd.f32 %v2276_v48, %v1160_v13 }
 0x1a3   : > { %1222 = vst [vmem:[%s2282_s14] sm:$0xff] %v1206_v50  ;;  %v1058_v53 = vadd.f32 %v2271_v38, %v1038_v51 }
 0x1a5   : > { %v1074_v27 = vmax.f32 %v1058_v53, 0.0  ;;  %v831_v56 = vpop.f32.mrf.mxu3 }
 0x1a6   : > { %v897_v47 = vadd.f32 %v896_v36, %v831_v56  ;;  %v1164_v56 = vadd.f32 %v2276_v48, %v1163_v28 }
 0x1a7   : > { %v1191_v57 = vadd.f32 %v1146_v60, %v1074_v27  ;;  %v902_v59 = vpop.f32.mrf.mxu0 }
 0x1a8   : > { %v995_v61 = vpop.f32.mrf.mxu1 }
 0x1a9   : > { %v1207_v62 = vmax.f32 %v1191_v57, 0.0  ;;  %v1039_v32 = vadd.f32 %v995_v61, %v897_v47  ;;  %v1169_v47 = vpop.f32.mrf.mxu2 }
 0x1ab   : > { %1223 = vst [vmem:[%s2282_s14 + $0x8] sm:$0xff] %v1207_v62  ;;  %v1059_v63 = vadd.f32 %v2271_v38, %v1039_v32 }
 0x1ad   : > { %v1075_v58 = vmax.f32 %v1059_v63, 0.0  ;;  %v834_v37 = vpop.f32.mrf.mxu3 }
 0x1ae   : > { %v900_v2 = vadd.f32 %v899_v49, %v834_v37  ;;  %v1167_v37 = vadd.f32 %v2276_v48, %v1166_v43 }
 0x1af   : > { %v1192_v3 = vadd.f32 %v1149_v55, %v1075_v58  ;;  %v905_v4 = vpop.f32.mrf.mxu0 }
 0x1b0   : > { %v998_v5 = vpop.f32.mrf.mxu1 }
 0x1b1   : > { %v1208_v7 = vmax.f32 %v1192_v3, 0.0  ;;  %v1040_v9 = vadd.f32 %v998_v5, %v900_v2  ;;  %v1172_v5 = vpop.f32.mrf.mxu2 }
 0x1b3   : > { %1224 = vst [vmem:[%s2282_s14 + $0x10] sm:$0xff] %v1208_v7  ;;  %v1060_v42 = vadd.f32 %v2271_v38, %v1040_v9 }
 0x1b5   : > { %v1076_v10 = vmax.f32 %v1060_v42, 0.0  ;;  %v837_v11 = vpop.f32.mrf.mxu3 }
 0x1b6   : > { %v903_v12 = vadd.f32 %v902_v59, %v837_v11  ;;  %v1170_v11 = vadd.f32 %v2276_v48, %v1169_v47 }
 0x1b7   : > { %v1193_v8 = vadd.f32 %v1152_v6, %v1076_v10  ;;  %v908_v52 = vpop.f32.mrf.mxu0 }
 0x1b8   : > { %v1001_v14 = vpop.f32.mrf.mxu1 }
 0x1b9   : > { %v1209_v15 = vmax.f32 %v1193_v8, 0.0  ;;  %v1041_v16 = vadd.f32 %v1001_v14, %v903_v12 }
 0x1bb   : > { %1225 = vst [vmem:[%s2282_s14 + $0x18] sm:$0xff] %v1209_v15  ;;  %v1061_v18 = vadd.f32 %v2271_v38, %v1041_v16  ;;  %v1175_v16 = vpop.f32.mrf.mxu2 }
 0x1bd   : > { %v1077_v20 = vmax.f32 %v1061_v18, 0.0  ;;  %v840_v1 = vpop.f32.mrf.mxu3 }
 0x1be   : > { %v906_v21 = vadd.f32 %v905_v4, %v840_v1  ;;  %v1173_v1 = vadd.f32 %v2276_v48, %v1172_v5 }
 0x1bf   : > { %v1194_v25 = vadd.f32 %v1155_v19, %v1077_v20  ;;  %v911_v26 = vpop.f32.mrf.mxu0 }
 0x1c0   : > { %v1004_v17 = vpop.f32.mrf.mxu1 }
 0x1c1   : > { %v1210_v29 = vmax.f32 %v1194_v25, 0.0  ;;  %v1042_v30 = vadd.f32 %v1004_v17, %v906_v21 }
 0x1c3   : > { %1226 = vst [vmem:[%s2282_s14 + $0x20] sm:$0xff] %v1210_v29  ;;  %v1062_v33 = vadd.f32 %v2271_v38, %v1042_v30 }
 0x1c5   : > { %v1078_v34 = vmax.f32 %v1062_v33, 0.0  ;;  %v843_v35 = vpop.f32.mrf.mxu3 }
 0x1c6   : > { %v909_v36 = vadd.f32 %v908_v52, %v843_v35  ;;  %v1176_v35 = vadd.f32 %v2276_v48, %v1175_v16  ;;  %v1311_v16 = vld [vmem:[%s2282_s14 + $0x18] sm:$0xff] (%p1692_p5) }
 0x1c7   : > { %v1195_v39 = vadd.f32 %v1158_v22, %v1078_v34  ;;  %v914_v40 = vpop.f32.mrf.mxu0  ;;  %v1178_v22 = vpop.f32.mrf.mxu2  ;;  %1312 = vst [vmem:[%s1246_s9 + $0x30] sm:$0xff] (%p1692_p5), %v1311_v16 }
 0x1c8   : > { %v1007_v23 = vpop.f32.mrf.mxu1 }
 0x1c9   : > { %v1211_v41 = vmax.f32 %v1195_v39, 0.0  ;;  %v1043_v31 = vadd.f32 %v1007_v23, %v909_v36 }
 0x1cb   : > { %1227 = vst [vmem:[%s2282_s14 + $0x28] sm:$0xff] %v1211_v41  ;;  %v1063_v44 = vadd.f32 %v2271_v38, %v1043_v31 }
 0x1cd   : > { %v1079_v46 = vmax.f32 %v1063_v44, 0.0  ;;  %v846_v49 = vpop.f32.mrf.mxu3 }
 0x1ce   : > { %v912_v24 = vadd.f32 %v911_v26, %v846_v49 }
 0x1cf   : > { %v1196_v50 = vadd.f32 %v1161_v45, %v1079_v46  ;;  %v917_v53 = vpop.f32.mrf.mxu0  ;;  %v1179_v46 = vadd.f32 %v2276_v48, %v1178_v22  ;;  %v1181_v49 = vpop.f32.mrf.mxu2 }
 0x1d0   : > { %v1010_v51 = vpop.f32.mrf.mxu1 }
 0x1d1   : > { %v1212_v54 = vmax.f32 %v1196_v50, 0.0  ;;  %v1044_v60 = vadd.f32 %v1010_v51, %v912_v24 }
 0x1d3   : > { %1228 = vst [vmem:[%s2282_s14 + $0x30] sm:$0xff] %v1212_v54  ;;  %v1064_v27 = vadd.f32 %v2271_v38, %v1044_v60 }
 0x1d5   : > { %v1080_v57 = vmax.f32 %v1064_v27, 0.0  ;;  %v849_v59 = vpop.f32.mrf.mxu3 }
 0x1d6   : > { %v915_v61 = vadd.f32 %v914_v40, %v849_v59 }
 0x1d7   : > { %v1197_v62 = vadd.f32 %v1164_v56, %v1080_v57  ;;  %v920_v0 = vpop.f32.mrf.mxu0  ;;  %v1182_v57 = vadd.f32 %v2276_v48, %v1181_v49 }
 0x1d8   : > { %v1013_v32 = vpop.f32.mrf.mxu1 }
 0x1d9   : > { %v1213_v63 = vmax.f32 %v1197_v62, 0.0  ;;  %v1045_v55 = vadd.f32 %v1013_v32, %v915_v61  ;;  %v1184_v32 = vpop.f32.mrf.mxu2 }
 0x1db   : > { %1229 = vst [vmem:[%s2282_s14 + $0x38] sm:$0xff] %v1213_v63  ;;  %v1065_v58 = vadd.f32 %v2271_v38, %v1045_v55 }
 0x1dd   : > { %v1081_v2 = vmax.f32 %v1065_v58, 0.0  ;;  %v852_v3 = vpop.f32.mrf.mxu3 }
 0x1de   : > { %v918_v4 = vadd.f32 %v917_v53, %v852_v3 }
 0x1df   : > { %v1198_v7 = vadd.f32 %v1167_v37, %v1081_v2  ;;  %v923_v12 = vpop.f32.mrf.mxu0  ;;  %v1185_v2 = vadd.f32 %v2276_v48, %v1184_v32 }
 0x1e0   : > { %v1016_v9 = vpop.f32.mrf.mxu1 }
 0x1e1   : > { %v1214_v42 = vmax.f32 %v1198_v7, 0.0  ;;  %v1046_v6 = vadd.f32 %v1016_v9, %v918_v4 }
 0x1e3   : > { %1230 = vst [vmem:[%s2282_s14 + $0x40] sm:$0xff] %v1214_v42  ;;  %v1066_v10 = vadd.f32 %v2271_v38, %v1046_v6  ;;  %v1187_v6 = vpop.f32.mrf.mxu2 }
 0x1e5   : > { %v1082_v13 = vmax.f32 %v1066_v10, 0.0  ;;  %v855_v8 = vpop.f32.mrf.mxu3 }
 0x1e6   : > { %v921_v52 = vadd.f32 %v920_v0, %v855_v8 }
 0x1e7   : > { %v1199_v14 = vadd.f32 %v1170_v11, %v1082_v13  ;;  %v926_v17 = vpop.f32.mrf.mxu0  ;;  %v1188_v13 = vadd.f32 %v2276_v48, %v1187_v6  ;;  %v1307_v48 = vld [vmem:[%s2282_s14 + $0x8] sm:$0xff] (%p1692_p5) }
 0x1e8   : > { %v1019_v15 = vpop.f32.mrf.mxu1  ;;  %1308 = vst [vmem:[%s1246_s9 + $0x10] sm:$0xff] (%p1692_p5), %v1307_v48 }
 0x1e9   : > { %v1215_v18 = vmax.f32 %v1199_v14, 0.0  ;;  %v1047_v19 = vadd.f32 %v1019_v15, %v921_v52  ;;  %v1309_v15 = vld [vmem:[%s2282_s14 + $0x10] sm:$0xff] (%p1692_p5) }
 0x1ea   : > { %1310 = vst [vmem:[%s1246_s9 + $0x20] sm:$0xff] (%p1692_p5), %v1309_v15 }
 0x1eb   : > { %1231 = vst [vmem:[%s2282_s14 + $0x48] sm:$0xff] %v1215_v18  ;;  %v1067_v20 = vadd.f32 %v2271_v38, %v1047_v19  ;;  %v1313_v18 = vld [vmem:[%s2282_s14 + $0x20] sm:$0xff] (%p1692_p5)  ;;  %v1315_v19 = vld [vmem:[%s2282_s14 + $0x28] sm:$0xff] (%p1692_p5) }
 0x1ec   : > { %1314 = vst [vmem:[%s1246_s9 + $0x40] sm:$0xff] (%p1692_p5), %v1313_v18 }
 0x1ed   : > { %v1083_v21 = vmax.f32 %v1067_v20, 0.0  ;;  %v858_v25 = vpop.f32.mrf.mxu3  ;;  %v1317_v20 = vld [vmem:[%s2282_s14 + $0x30] sm:$0xff] (%p1692_p5)  ;;  %1316 = vst [vmem:[%s1246_s9 + $0x50] sm:$0xff] (%p1692_p5), %v1315_v19 }
 0x1ee   : > { %v924_v26 = vadd.f32 %v923_v12, %v858_v25  ;;  %1318 = vst [vmem:[%s1246_s9 + $0x60] sm:$0xff] (%p1692_p5), %v1317_v20 }
 0x1ef   : > { %v1200_v28 = vadd.f32 %v1173_v1, %v1083_v21  ;;  %v929_v31 = vpop.f32.mrf.mxu0  ;;  %v1319_v1 = vld [vmem:[%s2282_s14 + $0x38] sm:$0xff] (%p1692_p5)  ;;  %v1321_v21 = vld [vmem:[%s2282_s14 + $0x40] sm:$0xff] (%p1692_p5) }
 0x1f0   : > { %v1022_v29 = vpop.f32.mrf.mxu1  ;;  %1320 = vst [vmem:[%s1246_s9 + $0x70] sm:$0xff] (%p1692_p5), %v1319_v1 }
 0x1f1   : > { %v1216_v30 = vmax.f32 %v1200_v28, 0.0  ;;  %v1048_v33 = vadd.f32 %v1022_v29, %v924_v26  ;;  %1322 = vst [vmem:[%s1246_s9 + $0x80] sm:$0xff] (%p1692_p5), %v1321_v21 }
 0x1f2   : > { %v1323_v25 = vld [vmem:[%s2282_s14 + $0x48] sm:$0xff] (%p1692_p5) }
 0x1f3   : > { %1232 = vst [vmem:[%s2282_s14 + $0x50] sm:$0xff] %v1216_v30  ;;  %v1068_v34 = vadd.f32 %v2271_v38, %v1048_v33 }
 0x1f4   : > { %1324 = vst [vmem:[%s1246_s9 + $0x90] sm:$0xff] (%p1692_p5), %v1323_v25 }
 0x1f5   : > { %v1084_v36 = vmax.f32 %v1068_v34, 0.0  ;;  %v861_v39 = vpop.f32.mrf.mxu3 }
 0x1f6   : > { %v927_v40 = vadd.f32 %v926_v17, %v861_v39 }
 0x1f7   : > { %v1201_v23 = vadd.f32 %v1176_v35, %v1084_v36  ;;  %v932_v56 = vpop.f32.mrf.mxu0 }
 0x1f8   : > { %v1025_v41 = vpop.f32.mrf.mxu1 }
 0x1f9   : > { %v1217_v43 = vmax.f32 %v1201_v23, 0.0  ;;  %v1049_v44 = vadd.f32 %v1025_v41, %v927_v40 }
 0x1fa   : > { %v1325_v26 = vld [vmem:[%s2282_s14 + $0x50] sm:$0xff] (%p1692_p5) }
 0x1fb   : > { %1233 = vst [vmem:[%s2282_s14 + $0x58] sm:$0xff] %v1217_v43  ;;  %v1069_v45 = vadd.f32 %v2271_v38, %v1049_v44 }
 0x1fc   : > { %1326 = vst [vmem:[%s1246_s9 + $0xa0] sm:$0xff] (%p1692_p5), %v1325_v26 }
 0x1fd   : > { %v1085_v24 = vmax.f32 %v1069_v45, 0.0  ;;  %v864_v50 = vpop.f32.mrf.mxu3 }
 0x1fe   : > { %v930_v51 = vadd.f32 %v929_v31, %v864_v50 }
 0x1ff   : > { %v1202_v54 = vadd.f32 %v1179_v46, %v1085_v24  ;;  %v935_v3 = vpop.f32.mrf.mxu0 }
 0x200   : > { %v1028_v53 = vpop.f32.mrf.mxu1 }
 0x201   : > { %v1218_v60 = vmax.f32 %v1202_v54, 0.0  ;;  %v1050_v27 = vadd.f32 %v1028_v53, %v930_v51 }
 0x202   : > { %v1327_v17 = vld [vmem:[%s2282_s14 + $0x58] sm:$0xff] (%p1692_p5) }
 0x203   : > { %1234 = vst [vmem:[%s2282_s14 + $0x60] sm:$0xff] %v1218_v60  ;;  %v1070_v47 = vadd.f32 %v2271_v38, %v1050_v27 }
 0x204   : > { %1328 = vst [vmem:[%s1246_s9 + $0xb0] sm:$0xff] (%p1692_p5), %v1327_v17 }
 0x205   : > { %v1086_v59 = vmax.f32 %v1070_v47, 0.0  ;;  %v867_v61 = vpop.f32.mrf.mxu3 }
 0x206   : > { %v933_v62 = vadd.f32 %v932_v56, %v867_v61 }
 0x207   : > { %v1203_v63 = vadd.f32 %v1182_v57, %v1086_v59 }
 0x208   : > { %v1031_v55 = vpop.f32.mrf.mxu1 }
 0x209   : > { %v1219_v0 = vmax.f32 %v1203_v63, 0.0  ;;  %v1051_v58 = vadd.f32 %v1031_v55, %v933_v62 }
 0x20a   : > { %v1329_v28 = vld [vmem:[%s2282_s14 + $0x60] sm:$0xff] (%p1692_p5) }
 0x20b   : > { %1235 = vst [vmem:[%s2282_s14 + $0x68] sm:$0xff] %v1219_v0  ;;  %v1071_v37 = vadd.f32 %v2271_v38, %v1051_v58 }
 0x20c   : > { %1330 = vst [vmem:[%s1246_s9 + $0xc0] sm:$0xff] (%p1692_p5), %v1329_v28 }
 0x20d   : > { %v1087_v4 = vmax.f32 %v1071_v37, 0.0  ;;  %v870_v5 = vpop.f32.mrf.mxu3 }
 0x20e   : > { %v936_v7 = vadd.f32 %v935_v3, %v870_v5 }
 0x20f   : > { %v1204_v9 = vadd.f32 %v1185_v2, %v1087_v4 }
 0x210   : > { %v1034_v42 = vpop.f32.mrf.mxu1 }
 0x211   : > { %v1220_v10 = vmax.f32 %v1204_v9, 0.0  ;;  %v1052_v11 = vadd.f32 %v1034_v42, %v936_v7 }
 0x212   : > { %v1331_v29 = vld [vmem:[%s2282_s14 + $0x68] sm:$0xff] (%p1692_p5) }
 0x213   : > { %1236 = vst [vmem:[%s2282_s14 + $0x70] sm:$0xff] %v1220_v10  ;;  %v1072_v12 = vadd.f32 %v2271_v38, %v1052_v11  ;;  %v1305_v38 = vld [vmem:[%s2282_s14] sm:$0xff] (%p1692_p5) }
 0x214   : > { %1306 = vst [vmem:[%s1246_s9] sm:$0xff] (%p1692_p5), %v1305_v38 }
 0x215   : > { %v1088_v8 = vmax.f32 %v1072_v12, 0.0  ;;  %1332 = vst [vmem:[%s1246_s9 + $0xd0] sm:$0xff] (%p1692_p5), %v1331_v29 }
 0x217   : > { %v1205_v52 = vadd.f32 %v1188_v13, %v1088_v8  ;;  %1244 = sbr.rel (!%p1692_p5) target bundleno = 548 (0x224), region = 90 }
 0x219   : > { %v1221_v14 = vmax.f32 %v1205_v52, 0.0 }
 0x21a   : > { %v1333_v30 = vld [vmem:[%s2282_s14 + $0x70] sm:$0xff] (%p1692_p5) }
 0x21b   : > { %1237 = vst [vmem:[%s2282_s14 + $0x78] sm:$0xff] %v1221_v14 }
 0x21c   : > { %1334 = vst [vmem:[%s1246_s9 + $0xe0] sm:$0xff] %v1333_v30 }
 0x222   : > { %v1335_v33 = vld [vmem:[%s2282_s14 + $0x78] sm:$0xff] }
 0x223   : > { %1336 = vst [vmem:[%s1246_s9 + $0xf0] sm:$0xff] %v1335_v33 }
 0x224 PF: > { %p14_p10 = scmp.ge.s32.totalorder %s1679_s28, 4   ;;  %s2372_s24 = smov %s1615_s25 }
 0x225   : > { %s2373_s25 = smov %s1690_s8  ;;  %s2374_s26 = smov %s1679_s28 }
 0x226   :  { %16 = sbr.rel (!%p14_p10) target bundleno = 2 (0x2), region = 168 }

</bundles_post_ra>
